<compile_context>
chip_gen: v5e
topology: v5e:2x2
jax: 0.10.0
libtpu: 0.0.40
codegen_flags: <defaults>
</compile_context>

<pallas_src>
import functools

import jax
import jax.numpy as jnp
import numpy as np
from jax.experimental import pallas as pl
from jax.experimental.pallas import tpu as pltpu


def _dot(a, w):
    return jnp.dot(a, w, preferred_element_type=jnp.float32)


def _leaky(x, slope=0.2):
    return jnp.maximum(x, slope * x)


def cvae_kernel(
    # streamed packed input [eps | x | y]  (per batch tile)
    pin_ref,
    # synthetic feature extractor over the packed input (eps rows zero)
    fe_w, fe_b,
    # encoder Linear(64 + cond, 48): feature half + zero-row-padded y half
    e1_wf, e1_wy, e1_b,
    # encoder Linear(48, 32) with SelfAttention(gamma fold) composed in
    e2_w, e2_b,
    # logvar head (narrow, lane-0-aligned for the std path)
    lv_w, lv_b,
    # packed-output placement of [mu | logvar] into the 128-lane slab
    mulv_wp,
    # decoder_pre Linear(latent + cond, 32): z half + zero-row-padded y half
    d1_wz, d1_wy, d1_b,
    # decoder_pre Linear(32, 48)
    d2_w, d2_b,
    # recon placement: decoder_post and physics-fold (through o_w), packed bias
    o_wp, ph_wp, packed_b,
    # single lane-dense packed output [mu | logvar | recon | 0...]
    out_ref,
    *, latent_dim,
):
    pin = pin_ref[...]                      # (TB, latent + input + output)
    eps = pin[:, :latent_dim]               # leading lanes -> aligned with mu

    # ---- synthetic multi-scale feature extractor -> (TB, 64) ----
    # TODO(synk): replace with the real multi-scale feature extractor.
    feat = _leaky(_dot(pin, fe_w[...]) + fe_b[...])

    # ---- encode: clamp(cat([feat, y]), -10, 10) -> Linear(64+cond, 48) ----
    # clipping the whole packed input is safe: non-y rows of e1_wy are zero.
    feat_c = jnp.clip(feat, -10.0, 10.0)
    pin_c = jnp.clip(pin, -10.0, 10.0)
    h = _leaky(_dot(feat_c, e1_wf[...]) + _dot(pin_c, e1_wy[...]) + e1_b[...])
    # SelfAttention (seq_len == 1) + gamma fold are composed into e2_w/e2_b.
    h = _leaky(_dot(h, e2_w[...]) + e2_b[...])          # (TB, 32)
    h = jnp.clip(h, -10.0, 10.0)

    # ---- packed output base: mu / logvar lanes + all biases ----
    out = _dot(h, mulv_wp[...]) + packed_b[...]         # (TB, 128)
    mu = out[:, :latent_dim]                            # free leading slice

    # std path needs lane-0-aligned logvar -> one narrow dot (same weights,
    # numerically identical to the packed logvar lanes; logvar in the output
    # stays UNclipped, matching torch forward).
    logvar = _dot(h, lv_w[...]) + lv_b[...]
    std = jnp.exp(0.5 * jnp.clip(logvar, -5.0, 2.0))
    z = mu + eps * std

    # ---- decode (raw, unclipped y via zero-row-padded weights) ----
    d = jnp.maximum(_dot(z, d1_wz[...]) + _dot(pin, d1_wy[...]) + d1_b[...], 0.0)
    d = jnp.maximum(_dot(d, d2_w[...]) + d2_b[...], 0.0)                 # (TB, 48)

    # ---- recon lanes: decoder_post + physics folded through o_w ----
    out_ref[...] = out + _dot(d, o_wp[...]) + _dot(pin, ph_wp[...])


_FUSED_ORDER = [
    "fe_w", "fe_b",
    "e1_wf", "e1_wy", "e1_b",
    "e2_w", "e2_b",
    "lv_w", "lv_b",
    "mulv_wp",
    "d1_wz", "d1_wy", "d1_b",
    "d2_w", "d2_b",
    "o_wp", "ph_wp", "packed_b",
]


def init_params(key, input_dim, output_dim, latent_dim):
    """Deterministic synthetic 'raw' parameters (PyTorch-module shapes)."""
    def mat(k, shape, scale=0.1):
        return scale * jax.random.normal(k, shape, dtype=jnp.float32)

    keys = jax.random.split(key, 16)
    return {
        # synthetic feature extractor: Linear(input_dim + output_dim, 64)
        "fe_wx": mat(keys[0], (input_dim, 64)),
        "fe_wy": mat(keys[1], (output_dim, 64)),
        "fe_b": jnp.zeros((1, 64), jnp.float32),
        # encoder Linear(64 + output_dim, 48)
        "e1_wf": mat(keys[2], (64, 48)),
        "e1_wy": mat(keys[3], (output_dim, 48)),
        "e1_b": jnp.zeros((1, 48), jnp.float32),
        # SelfAttention(48): value projection (query/key unused, seq_len == 1)
        "at_wv": mat(keys[4], (48, 48)),
        "at_bv": jnp.zeros((1, 48), jnp.float32),
        "at_g": jnp.zeros((1, 1), jnp.float32),          # torch.zeros(1)
        # encoder Linear(48, 32)
        "e2_w": mat(keys[5], (48, 32)),
        "e2_b": jnp.zeros((1, 32), jnp.float32),
        # fc_mu / fc_var: Linear(32, latent_dim)
        "mu_w": mat(keys[6], (32, latent_dim)),
        "mu_b": jnp.zeros((1, latent_dim), jnp.float32),
        "lv_w": mat(keys[7], (32, latent_dim)),
        "lv_b": jnp.zeros((1, latent_dim), jnp.float32),
        # decoder_pre: Linear(latent_dim + output_dim, 32), Linear(32, 48)
        "d1_wz": mat(keys[8], (latent_dim, 32)),
        "d1_wy": mat(keys[9], (output_dim, 32)),
        "d1_b": jnp.zeros((1, 32), jnp.float32),
        "d2_w": mat(keys[10], (32, 48)),
        "d2_b": jnp.zeros((1, 48), jnp.float32),
        # physics layer: Linear(output_dim, 48), gamma = 0.1
        "ph_w": mat(keys[11], (output_dim, 48)),
        "ph_b": jnp.zeros((1, 48), jnp.float32),
        "ph_g": jnp.full((1, 1), 0.1, jnp.float32),      # torch.ones(1) * 0.1
        # decoder_post: Linear(48, input_dim)
        "o_w": mat(keys[12], (48, input_dim)),
        "o_b": jnp.zeros((1, input_dim), jnp.float32),
    }


def fuse_params(p):
    """Wrapper-side weight fusion / folding (done once, zero kernel cost)."""
    hp = jax.lax.Precision.HIGHEST
    f32 = jnp.float32
    input_dim = p["fe_wx"].shape[0]
    output_dim = p["fe_wy"].shape[0]
    latent_dim = p["mu_w"].shape[1]
    attn_dim = p["at_wv"].shape[0]

    packed_dim = input_dim + 2 * latent_dim
    packed_pad = max(128, ((packed_dim + 127) // 128) * 128)   # lane-dense out
    in_total = latent_dim + input_dim + output_dim
    x_off = latent_dim                       # packed input = [eps | x | y]
    y_off = latent_dim + input_dim
    mu_off, lv_off, rc_off = 0, latent_dim, 2 * latent_dim     # [mu|logvar|recon]

    at_g = p["at_g"][0, 0]
    ph_g = p["ph_g"][0, 0]

    def rows_pad(w, off):
        z = jnp.zeros((in_total, w.shape[1]), f32)
        return z.at[off:off + w.shape[0], :].set(w)

    def cols_pad(w, off):
        z = jnp.zeros((w.shape[0], packed_pad), f32)
        return z.at[:, off:off + w.shape[1]].set(w)

    # synthetic feature extractor over the packed input (eps rows zero)
    fe_w = rows_pad(jnp.concatenate([p["fe_wx"], p["fe_wy"]], axis=0), x_off)

    # SelfAttention (seq_len==1): gamma*value(h)+h == h @ (I + g*Wv) + g*bv,
    # then composed with the following Linear(48,32): no nonlinearity between.
    at_w = jnp.eye(attn_dim, dtype=f32) + at_g * p["at_wv"]
    e2_w = jnp.dot(at_w, p["e2_w"], precision=hp)
    e2_b = jnp.dot(at_g * p["at_bv"], p["e2_w"], precision=hp) + p["e2_b"]

    # physics layer folded through decoder_post:
    #   (d + g*(y@ph_w + ph_b)) @ o_w + o_b
    # == d@o_w + y@(g*ph_w@o_w) + (o_b + g*ph_b@o_w)
    ph_fold_w = ph_g * jnp.dot(p["ph_w"], p["o_w"], precision=hp)
    ph_fold_b = ph_g * jnp.dot(p["ph_b"], p["o_w"], precision=hp)

    # packed-output placements (128 lanes: [mu | logvar | recon | 0...])
    mulv_wp = cols_pad(jnp.concatenate([p["mu_w"], p["lv_w"]], axis=1), mu_off)
    o_wp = cols_pad(p["o_w"], rc_off)
    ph_wp = rows_pad(cols_pad(ph_fold_w, rc_off), y_off)
    packed_b = jnp.zeros((1, packed_pad), f32)
    packed_b = packed_b.at[:, mu_off:mu_off + latent_dim].set(p["mu_b"])
    packed_b = packed_b.at[:, lv_off:lv_off + latent_dim].set(p["lv_b"])
    packed_b = packed_b.at[:, rc_off:rc_off + input_dim].set(p["o_b"] + ph_fold_b)

    return {
        "fe_w": fe_w, "fe_b": p["fe_b"],
        "e1_wf": p["e1_wf"], "e1_wy": rows_pad(p["e1_wy"], y_off), "e1_b": p["e1_b"],
        "e2_w": e2_w, "e2_b": e2_b,
        "lv_w": p["lv_w"], "lv_b": p["lv_b"],
        "mulv_wp": mulv_wp,
        "d1_wz": p["d1_wz"], "d1_wy": rows_pad(p["d1_wy"], y_off), "d1_b": p["d1_b"],
        "d2_w": p["d2_w"], "d2_b": p["d2_b"],
        "o_wp": o_wp, "ph_wp": ph_wp, "packed_b": packed_b,
    }


def _round8(n):
    return max(8, ((int(n) + 7) // 8) * 8)


def conditional_vae_forward(x, y, eps, fp, *, block_b=1024):
    """Fused forward pass. Returns (recon, mu, logvar)."""
    B, input_dim = x.shape
    output_dim = y.shape[1]
    latent_dim = eps.shape[1]
    packed_dim = input_dim + 2 * latent_dim

    in_total = fp["fe_w"].shape[0]
    packed_pad = fp["packed_b"].shape[1]
    assert in_total == latent_dim + input_dim + output_dim

    # ---- tile selection: big tiles, tiny grid (2 steps when batch allows,
    # so a "parallel" grid axis shards across both v7x TensorCores) ----
    Bp8 = _round8(B)
    tb = min(_round8(block_b), Bp8)
    if Bp8 >= 16:
        tb = min(tb, _round8((Bp8 + 1) // 2))
    n_blocks = pl.cdiv(Bp8, tb)
    Bp = n_blocks * tb

    # single packed input stream [eps | x | y]
    pin = jnp.concatenate([eps, x, y], axis=1)
    if Bp != B:
        pin = jnp.pad(pin, ((0, Bp - B), (0, 0)))

    weights = [fp[k] for k in _FUSED_ORDER]

    data_spec = pl.BlockSpec((tb, in_total), lambda i: (i, 0))
    # constant index_map -> weights stay VMEM-resident across grid steps
    weight_specs = [pl.BlockSpec(tuple(w.shape), lambda i: (0, 0)) for w in weights]
    out_spec = pl.BlockSpec((tb, packed_pad), lambda i: (i, 0))

    # VMEM budget from actual footprint (double-buffered I/O + resident weights
    # + live intermediates), ~2x headroom, capped below v7x's 64 MiB.
    io_bytes = 4 * tb * (in_total + packed_pad)
    work_bytes = 4 * tb * (2 * 64 + in_total + 48 + 32 + packed_pad
                           + 4 * latent_dim + 32 + 48)
    w_bytes = 4 * sum(int(w.size) for w in weights)
    vmem_limit = int(min(64 * 2 ** 20,
                         max(4 * 2 ** 20, 2 * (2 * io_bytes + work_bytes + 2 * w_bytes))))

    packed = pl.pallas_call(
        functools.partial(cvae_kernel, latent_dim=latent_dim),
        out_shape=jax.ShapeDtypeStruct((Bp, packed_pad), jnp.float32),
        grid=(n_blocks,),
        in_specs=[data_spec] + weight_specs,
        out_specs=out_spec,
        compiler_params=pltpu.CompilerParams(
            dimension_semantics=("parallel",),
            vmem_limit_bytes=vmem_limit,
        ),
    )(pin, *weights)

    packed = packed[:B]
    mu = packed[:, :latent_dim]
    logvar = packed[:, latent_dim:2 * latent_dim]
    recon = packed[:, 2 * latent_dim:2 * latent_dim + input_dim]
    assert packed_dim <= packed_pad
    return recon, mu, logvar


def reference_forward(x, y, eps, p):
    """Pure-JAX reference of the PyTorch module (unfused, unfolded)."""
    hp = jax.lax.Precision.HIGHEST
    dot = lambda a, w: jnp.dot(a, w, precision=hp)
    leaky = lambda v: jnp.where(v >= 0, v, 0.2 * v)

    feat = leaky(dot(x, p["fe_wx"]) + dot(y, p["fe_wy"]) + p["fe_b"])
    cond = jnp.clip(jnp.concatenate([feat, y], axis=1), -10.0, 10.0)
    h = leaky(dot(cond[:, :64], p["e1_wf"]) + dot(cond[:, 64:], p["e1_wy"]) + p["e1_b"])
    v = dot(h, p["at_wv"]) + p["at_bv"]                 # seq_len == 1 attention
    h = p["at_g"][0, 0] * v + h
    h = leaky(dot(h, p["e2_w"]) + p["e2_b"])
    h = jnp.clip(h, -10.0, 10.0)
    mu = dot(h, p["mu_w"]) + p["mu_b"]
    logvar = dot(h, p["lv_w"]) + p["lv_b"]
    std = jnp.exp(0.5 * jnp.clip(logvar, -5.0, 2.0))
    z = mu + eps * std
    d = jax.nn.relu(dot(z, p["d1_wz"]) + dot(y, p["d1_wy"]) + p["d1_b"])
    d = jax.nn.relu(dot(d, p["d2_w"]) + p["d2_b"])
    d = d + p["ph_g"][0, 0] * (dot(y, p["ph_w"]) + p["ph_b"])
    recon = dot(d, p["o_w"]) + p["o_b"]
    return recon, mu, logvar


if __name__ == "__main__":
    B, INPUT_DIM, OUTPUT_DIM, LATENT_DIM = 128, 16, 4, 8

    root = jax.random.PRNGKey(0)
    k_x, k_y, k_eps, k_params = jax.random.split(root, 4)

    x = jax.random.normal(k_x, (B, INPUT_DIM), dtype=jnp.float32)
    y = jax.random.normal(k_y, (B, OUTPUT_DIM), dtype=jnp.float32)
    eps = jax.random.normal(k_eps, (B, LATENT_DIM), dtype=jnp.float32)

    raw_params = init_params(k_params, INPUT_DIM, OUTPUT_DIM, LATENT_DIM)
    fused_params = fuse_params(raw_params)

    recon, mu, logvar = conditional_vae_forward(x, y, eps, fused_params)
    jax.block_until_ready((recon, mu, logvar))

    assert recon.shape == (B, INPUT_DIM)
    assert mu.shape == (B, LATENT_DIM)
    assert logvar.shape == (B, LATENT_DIM)
    assert bool(jnp.all(jnp.isfinite(recon)))
    assert bool(jnp.all(jnp.isfinite(mu)))
    assert bool(jnp.all(jnp.isfinite(logvar)))

    # correctness check against the unfused pure-JAX reference
    r_recon, r_mu, r_logvar = reference_forward(x, y, eps, raw_params)
    np.testing.assert_allclose(np.asarray(recon), np.asarray(r_recon), rtol=1e-2, atol=1e-3)
    np.testing.assert_allclose(np.asarray(mu), np.asarray(r_mu), rtol=1e-2, atol=1e-3)
    np.testing.assert_allclose(np.asarray(logvar), np.asarray(r_logvar), rtol=1e-2, atol=1e-3)

    print("KERNEL_OK")
</pallas_src>

<mosaic_0001>
module attributes {stable_mosaic.version = 11 : i64} {
  func.func @cvae_kernel(%arg0: i32, %arg1: memref<64x28xf32, #tpu.memory_space<vmem>>, %arg2: memref<28x64xf32, #tpu.memory_space<vmem>>, %arg3: memref<1x64xf32, #tpu.memory_space<vmem>>, %arg4: memref<64x48xf32, #tpu.memory_space<vmem>>, %arg5: memref<28x48xf32, #tpu.memory_space<vmem>>, %arg6: memref<1x48xf32, #tpu.memory_space<vmem>>, %arg7: memref<48x32xf32, #tpu.memory_space<vmem>>, %arg8: memref<1x32xf32, #tpu.memory_space<vmem>>, %arg9: memref<32x8xf32, #tpu.memory_space<vmem>>, %arg10: memref<1x8xf32, #tpu.memory_space<vmem>>, %arg11: memref<32x128xf32, #tpu.memory_space<vmem>>, %arg12: memref<8x32xf32, #tpu.memory_space<vmem>>, %arg13: memref<28x32xf32, #tpu.memory_space<vmem>>, %arg14: memref<1x32xf32, #tpu.memory_space<vmem>>, %arg15: memref<32x48xf32, #tpu.memory_space<vmem>>, %arg16: memref<1x48xf32, #tpu.memory_space<vmem>>, %arg17: memref<48x128xf32, #tpu.memory_space<vmem>>, %arg18: memref<28x128xf32, #tpu.memory_space<vmem>>, %arg19: memref<1x128xf32, #tpu.memory_space<vmem>>, %arg20: memref<64x128xf32, #tpu.memory_space<vmem>>) attributes {dimension_semantics = [#tpu.dimension_semantics<parallel>], iteration_bounds = array<i64: 2>, scalar_prefetch = 0 : i64, scratch_operands = 0 : i64, tpu.core_type = #tpu.core_type<tc>, window_params = [{transform_indices = @transform_0, window_bounds = array<i64: 64, 28>}, {pipeline_mode = #tpu.pipeline_mode<synchronous>, transform_indices = @transform_1, window_bounds = array<i64: 28, 64>}, {pipeline_mode = #tpu.pipeline_mode<synchronous>, transform_indices = @transform_2, window_bounds = array<i64: 1, 64>}, {pipeline_mode = #tpu.pipeline_mode<synchronous>, transform_indices = @transform_3, window_bounds = array<i64: 64, 48>}, {pipeline_mode = #tpu.pipeline_mode<synchronous>, transform_indices = @transform_4, window_bounds = array<i64: 28, 48>}, {pipeline_mode = #tpu.pipeline_mode<synchronous>, transform_indices = @transform_5, window_bounds = array<i64: 1, 48>}, {pipeline_mode = #tpu.pipeline_mode<synchronous>, transform_indices = @transform_6, window_bounds = array<i64: 48, 32>}, {pipeline_mode = #tpu.pipeline_mode<synchronous>, transform_indices = @transform_7, window_bounds = array<i64: 1, 32>}, {pipeline_mode = #tpu.pipeline_mode<synchronous>, transform_indices = @transform_8, window_bounds = array<i64: 32, 8>}, {pipeline_mode = #tpu.pipeline_mode<synchronous>, transform_indices = @transform_9, window_bounds = array<i64: 1, 8>}, {pipeline_mode = #tpu.pipeline_mode<synchronous>, transform_indices = @transform_10, window_bounds = array<i64: 32, 128>}, {pipeline_mode = #tpu.pipeline_mode<synchronous>, transform_indices = @transform_11, window_bounds = array<i64: 8, 32>}, {pipeline_mode = #tpu.pipeline_mode<synchronous>, transform_indices = @transform_12, window_bounds = array<i64: 28, 32>}, {pipeline_mode = #tpu.pipeline_mode<synchronous>, transform_indices = @transform_13, window_bounds = array<i64: 1, 32>}, {pipeline_mode = #tpu.pipeline_mode<synchronous>, transform_indices = @transform_14, window_bounds = array<i64: 32, 48>}, {pipeline_mode = #tpu.pipeline_mode<synchronous>, transform_indices = @transform_15, window_bounds = array<i64: 1, 48>}, {pipeline_mode = #tpu.pipeline_mode<synchronous>, transform_indices = @transform_16, window_bounds = array<i64: 48, 128>}, {pipeline_mode = #tpu.pipeline_mode<synchronous>, transform_indices = @transform_17, window_bounds = array<i64: 28, 128>}, {pipeline_mode = #tpu.pipeline_mode<synchronous>, transform_indices = @transform_18, window_bounds = array<i64: 1, 128>}, {transform_indices = @transform_19, window_bounds = array<i64: 64, 128>}]} {
    %c0 = arith.constant 0 : index
    %c0_0 = arith.constant 0 : index
    %0 = vector.load %arg1[%c0, %c0_0] : memref<64x28xf32, #tpu.memory_space<vmem>>, vector<64x28xf32>
    %1 = vector.extract_strided_slice %0 {offsets = [0, 0], sizes = [64, 8], strides = [1, 1]} : vector<64x28xf32> to vector<64x8xf32>
    %c0_1 = arith.constant 0 : index
    %c0_2 = arith.constant 0 : index
    %2 = vector.load %arg2[%c0_1, %c0_2] : memref<28x64xf32, #tpu.memory_space<vmem>>, vector<28x64xf32>
    %cst = arith.constant dense<0.000000e+00> : vector<64x64xf32>
    %3 = tpu.matmul %0, %2, %cst {dimension_numbers = #tpu.dot_dimension_numbers<[1], [0], [0], [1], [0, 0, 1, 1], [], []>} : vector<64x28xf32>, vector<28x64xf32>, vector<64x64xf32> -> vector<64x64xf32>
    %c0_3 = arith.constant 0 : index
    %c0_4 = arith.constant 0 : index
    %4 = vector.load %arg3[%c0_3, %c0_4] : memref<1x64xf32, #tpu.memory_space<vmem>>, vector<1x64xf32>
    %5 = vector.broadcast %4 : vector<1x64xf32> to vector<64x64xf32>
    %6 = arith.addf %3, %5 : vector<64x64xf32>
    %cst_5 = arith.constant 2.000000e-01 : f32
    %7 = vector.broadcast %cst_5 : f32 to vector<64x64xf32>
    %8 = arith.mulf %7, %6 : vector<64x64xf32>
    %9 = arith.maximumf %6, %8 : vector<64x64xf32>
    %cst_6 = arith.constant -1.000000e+01 : f32
    %cst_7 = arith.constant 1.000000e+01 : f32
    %10 = vector.broadcast %cst_6 : f32 to vector<64x64xf32>
    %11 = arith.maximumf %10, %9 : vector<64x64xf32>
    %12 = vector.broadcast %cst_7 : f32 to vector<64x64xf32>
    %13 = arith.minimumf %12, %11 : vector<64x64xf32>
    %cst_8 = arith.constant -1.000000e+01 : f32
    %cst_9 = arith.constant 1.000000e+01 : f32
    %14 = vector.broadcast %cst_8 : f32 to vector<64x28xf32>
    %15 = arith.maximumf %14, %0 : vector<64x28xf32>
    %16 = vector.broadcast %cst_9 : f32 to vector<64x28xf32>
    %17 = arith.minimumf %16, %15 : vector<64x28xf32>
    %c0_10 = arith.constant 0 : index
    %c0_11 = arith.constant 0 : index
    %18 = vector.load %arg4[%c0_10, %c0_11] : memref<64x48xf32, #tpu.memory_space<vmem>>, vector<64x48xf32>
    %cst_12 = arith.constant dense<0.000000e+00> : vector<64x48xf32>
    %19 = tpu.matmul %13, %18, %cst_12 {dimension_numbers = #tpu.dot_dimension_numbers<[1], [0], [0], [1], [0, 0, 1, 1], [], []>} : vector<64x64xf32>, vector<64x48xf32>, vector<64x48xf32> -> vector<64x48xf32>
    %c0_13 = arith.constant 0 : index
    %c0_14 = arith.constant 0 : index
    %20 = vector.load %arg5[%c0_13, %c0_14] : memref<28x48xf32, #tpu.memory_space<vmem>>, vector<28x48xf32>
    %cst_15 = arith.constant dense<0.000000e+00> : vector<64x48xf32>
    %21 = tpu.matmul %17, %20, %cst_15 {dimension_numbers = #tpu.dot_dimension_numbers<[1], [0], [0], [1], [0, 0, 1, 1], [], []>} : vector<64x28xf32>, vector<28x48xf32>, vector<64x48xf32> -> vector<64x48xf32>
    %22 = arith.addf %19, %21 : vector<64x48xf32>
    %c0_16 = arith.constant 0 : index
    %c0_17 = arith.constant 0 : index
    %23 = vector.load %arg6[%c0_16, %c0_17] : memref<1x48xf32, #tpu.memory_space<vmem>>, vector<1x48xf32>
    %24 = vector.broadcast %23 : vector<1x48xf32> to vector<64x48xf32>
    %25 = arith.addf %22, %24 : vector<64x48xf32>
    %cst_18 = arith.constant 2.000000e-01 : f32
    %26 = vector.broadcast %cst_18 : f32 to vector<64x48xf32>
    %27 = arith.mulf %26, %25 : vector<64x48xf32>
    %28 = arith.maximumf %25, %27 : vector<64x48xf32>
    %c0_19 = arith.constant 0 : index
    %c0_20 = arith.constant 0 : index
    %29 = vector.load %arg7[%c0_19, %c0_20] : memref<48x32xf32, #tpu.memory_space<vmem>>, vector<48x32xf32>
    %cst_21 = arith.constant dense<0.000000e+00> : vector<64x32xf32>
    %30 = tpu.matmul %28, %29, %cst_21 {dimension_numbers = #tpu.dot_dimension_numbers<[1], [0], [0], [1], [0, 0, 1, 1], [], []>} : vector<64x48xf32>, vector<48x32xf32>, vector<64x32xf32> -> vector<64x32xf32>
    %c0_22 = arith.constant 0 : index
    %c0_23 = arith.constant 0 : index
    %31 = vector.load %arg8[%c0_22, %c0_23] : memref<1x32xf32, #tpu.memory_space<vmem>>, vector<1x32xf32>
    %32 = vector.broadcast %31 : vector<1x32xf32> to vector<64x32xf32>
    %33 = arith.addf %30, %32 : vector<64x32xf32>
    %cst_24 = arith.constant 2.000000e-01 : f32
    %34 = vector.broadcast %cst_24 : f32 to vector<64x32xf32>
    %35 = arith.mulf %34, %33 : vector<64x32xf32>
    %36 = arith.maximumf %33, %35 : vector<64x32xf32>
    %cst_25 = arith.constant -1.000000e+01 : f32
    %cst_26 = arith.constant 1.000000e+01 : f32
    %37 = vector.broadcast %cst_25 : f32 to vector<64x32xf32>
    %38 = arith.maximumf %37, %36 : vector<64x32xf32>
    %39 = vector.broadcast %cst_26 : f32 to vector<64x32xf32>
    %40 = arith.minimumf %39, %38 : vector<64x32xf32>
    %c0_27 = arith.constant 0 : index
    %c0_28 = arith.constant 0 : index
    %41 = vector.load %arg11[%c0_27, %c0_28] : memref<32x128xf32, #tpu.memory_space<vmem>>, vector<32x128xf32>
    %cst_29 = arith.constant dense<0.000000e+00> : vector<64x128xf32>
    %42 = tpu.matmul %40, %41, %cst_29 {dimension_numbers = #tpu.dot_dimension_numbers<[1], [0], [0], [1], [0, 0, 1, 1], [], []>} : vector<64x32xf32>, vector<32x128xf32>, vector<64x128xf32> -> vector<64x128xf32>
    %c0_30 = arith.constant 0 : index
    %c0_31 = arith.constant 0 : index
    %43 = vector.load %arg19[%c0_30, %c0_31] : memref<1x128xf32, #tpu.memory_space<vmem>>, vector<1x128xf32>
    %44 = vector.broadcast %43 : vector<1x128xf32> to vector<64x128xf32>
    %45 = arith.addf %42, %44 : vector<64x128xf32>
    %46 = vector.extract_strided_slice %45 {offsets = [0, 0], sizes = [64, 8], strides = [1, 1]} : vector<64x128xf32> to vector<64x8xf32>
    %c0_32 = arith.constant 0 : index
    %c0_33 = arith.constant 0 : index
    %47 = vector.load %arg9[%c0_32, %c0_33] : memref<32x8xf32, #tpu.memory_space<vmem>>, vector<32x8xf32>
    %cst_34 = arith.constant dense<0.000000e+00> : vector<64x8xf32>
    %48 = tpu.matmul %40, %47, %cst_34 {dimension_numbers = #tpu.dot_dimension_numbers<[1], [0], [0], [1], [0, 0, 1, 1], [], []>} : vector<64x32xf32>, vector<32x8xf32>, vector<64x8xf32> -> vector<64x8xf32>
    %c0_35 = arith.constant 0 : index
    %c0_36 = arith.constant 0 : index
    %49 = vector.load %arg10[%c0_35, %c0_36] : memref<1x8xf32, #tpu.memory_space<vmem>>, vector<1x8xf32>
    %50 = vector.broadcast %49 : vector<1x8xf32> to vector<64x8xf32>
    %51 = arith.addf %48, %50 : vector<64x8xf32>
    %cst_37 = arith.constant -5.000000e+00 : f32
    %cst_38 = arith.constant 2.000000e+00 : f32
    %52 = vector.broadcast %cst_37 : f32 to vector<64x8xf32>
    %53 = arith.maximumf %52, %51 : vector<64x8xf32>
    %54 = vector.broadcast %cst_38 : f32 to vector<64x8xf32>
    %55 = arith.minimumf %54, %53 : vector<64x8xf32>
    %cst_39 = arith.constant 5.000000e-01 : f32
    %56 = vector.broadcast %cst_39 : f32 to vector<64x8xf32>
    %57 = arith.mulf %56, %55 : vector<64x8xf32>
    %58 = math.exp %57 : vector<64x8xf32>
    %59 = arith.mulf %1, %58 : vector<64x8xf32>
    %60 = arith.addf %46, %59 : vector<64x8xf32>
    %c0_40 = arith.constant 0 : index
    %c0_41 = arith.constant 0 : index
    %61 = vector.load %arg12[%c0_40, %c0_41] : memref<8x32xf32, #tpu.memory_space<vmem>>, vector<8x32xf32>
    %cst_42 = arith.constant dense<0.000000e+00> : vector<64x32xf32>
    %62 = tpu.matmul %60, %61, %cst_42 {dimension_numbers = #tpu.dot_dimension_numbers<[1], [0], [0], [1], [0, 0, 1, 1], [], []>} : vector<64x8xf32>, vector<8x32xf32>, vector<64x32xf32> -> vector<64x32xf32>
    %c0_43 = arith.constant 0 : index
    %c0_44 = arith.constant 0 : index
    %63 = vector.load %arg13[%c0_43, %c0_44] : memref<28x32xf32, #tpu.memory_space<vmem>>, vector<28x32xf32>
    %cst_45 = arith.constant dense<0.000000e+00> : vector<64x32xf32>
    %64 = tpu.matmul %0, %63, %cst_45 {dimension_numbers = #tpu.dot_dimension_numbers<[1], [0], [0], [1], [0, 0, 1, 1], [], []>} : vector<64x28xf32>, vector<28x32xf32>, vector<64x32xf32> -> vector<64x32xf32>
    %65 = arith.addf %62, %64 : vector<64x32xf32>
    %c0_46 = arith.constant 0 : index
    %c0_47 = arith.constant 0 : index
    %66 = vector.load %arg14[%c0_46, %c0_47] : memref<1x32xf32, #tpu.memory_space<vmem>>, vector<1x32xf32>
    %67 = vector.broadcast %66 : vector<1x32xf32> to vector<64x32xf32>
    %68 = arith.addf %65, %67 : vector<64x32xf32>
    %cst_48 = arith.constant 0.000000e+00 : f32
    %69 = vector.broadcast %cst_48 : f32 to vector<64x32xf32>
    %70 = arith.maximumf %68, %69 : vector<64x32xf32>
    %c0_49 = arith.constant 0 : index
    %c0_50 = arith.constant 0 : index
    %71 = vector.load %arg15[%c0_49, %c0_50] : memref<32x48xf32, #tpu.memory_space<vmem>>, vector<32x48xf32>
    %cst_51 = arith.constant dense<0.000000e+00> : vector<64x48xf32>
    %72 = tpu.matmul %70, %71, %cst_51 {dimension_numbers = #tpu.dot_dimension_numbers<[1], [0], [0], [1], [0, 0, 1, 1], [], []>} : vector<64x32xf32>, vector<32x48xf32>, vector<64x48xf32> -> vector<64x48xf32>
    %c0_52 = arith.constant 0 : index
    %c0_53 = arith.constant 0 : index
    %73 = vector.load %arg16[%c0_52, %c0_53] : memref<1x48xf32, #tpu.memory_space<vmem>>, vector<1x48xf32>
    %74 = vector.broadcast %73 : vector<1x48xf32> to vector<64x48xf32>
    %75 = arith.addf %72, %74 : vector<64x48xf32>
    %cst_54 = arith.constant 0.000000e+00 : f32
    %76 = vector.broadcast %cst_54 : f32 to vector<64x48xf32>
    %77 = arith.maximumf %75, %76 : vector<64x48xf32>
    %c0_55 = arith.constant 0 : index
    %c0_56 = arith.constant 0 : index
    %78 = vector.load %arg17[%c0_55, %c0_56] : memref<48x128xf32, #tpu.memory_space<vmem>>, vector<48x128xf32>
    %cst_57 = arith.constant dense<0.000000e+00> : vector<64x128xf32>
    %79 = tpu.matmul %77, %78, %cst_57 {dimension_numbers = #tpu.dot_dimension_numbers<[1], [0], [0], [1], [0, 0, 1, 1], [], []>} : vector<64x48xf32>, vector<48x128xf32>, vector<64x128xf32> -> vector<64x128xf32>
    %80 = arith.addf %45, %79 : vector<64x128xf32>
    %c0_58 = arith.constant 0 : index
    %c0_59 = arith.constant 0 : index
    %81 = vector.load %arg18[%c0_58, %c0_59] : memref<28x128xf32, #tpu.memory_space<vmem>>, vector<28x128xf32>
    %cst_60 = arith.constant dense<0.000000e+00> : vector<64x128xf32>
    %82 = tpu.matmul %0, %81, %cst_60 {dimension_numbers = #tpu.dot_dimension_numbers<[1], [0], [0], [1], [0, 0, 1, 1], [], []>} : vector<64x28xf32>, vector<28x128xf32>, vector<64x128xf32> -> vector<64x128xf32>
    %83 = arith.addf %80, %82 : vector<64x128xf32>
    %c0_61 = arith.constant 0 : index
    %c0_62 = arith.constant 0 : index
    %84 = vector.load %arg20[%c0_61, %c0_62] : memref<64x128xf32, #tpu.memory_space<vmem>>, vector<64x128xf32>
    tpu.vector_store %arg20[%c0_61, %c0_62], %83 {strides = array<i32>} : memref<64x128xf32, #tpu.memory_space<vmem>>, vector<64x128xf32>,
    return
  }
  func.func @transform_0(%arg0: i32) -> (i32, i32) {
    %c0_i32 = arith.constant 0 : i32
    %c0_i32_0 = arith.constant 0 : i32
    return %arg0, %c0_i32 : i32, i32
  }
  func.func @transform_1(%arg0: i32) -> (i32, i32) {
    %c0_i32 = arith.constant 0 : i32
    %c0_i32_0 = arith.constant 0 : i32
    %c0_i32_1 = arith.constant 0 : i32
    return %c0_i32, %c0_i32_0 : i32, i32
  }
  func.func @transform_2(%arg0: i32) -> (i32, i32) {
    %c0_i32 = arith.constant 0 : i32
    %c0_i32_0 = arith.constant 0 : i32
    %c0_i32_1 = arith.constant 0 : i32
    return %c0_i32, %c0_i32_0 : i32, i32
  }
  func.func @transform_3(%arg0: i32) -> (i32, i32) {
    %c0_i32 = arith.constant 0 : i32
    %c0_i32_0 = arith.constant 0 : i32
    %c0_i32_1 = arith.constant 0 : i32
    return %c0_i32, %c0_i32_0 : i32, i32
  }
  func.func @transform_4(%arg0: i32) -> (i32, i32) {
    %c0_i32 = arith.constant 0 : i32
    %c0_i32_0 = arith.constant 0 : i32
    %c0_i32_1 = arith.constant 0 : i32
    return %c0_i32, %c0_i32_0 : i32, i32
  }
  func.func @transform_5(%arg0: i32) -> (i32, i32) {
    %c0_i32 = arith.constant 0 : i32
    %c0_i32_0 = arith.constant 0 : i32
    %c0_i32_1 = arith.constant 0 : i32
    return %c0_i32, %c0_i32_0 : i32, i32
  }
  func.func @transform_6(%arg0: i32) -> (i32, i32) {
    %c0_i32 = arith.constant 0 : i32
    %c0_i32_0 = arith.constant 0 : i32
    %c0_i32_1 = arith.constant 0 : i32
    return %c0_i32, %c0_i32_0 : i32, i32
  }
  func.func @transform_7(%arg0: i32) -> (i32, i32) {
    %c0_i32 = arith.constant 0 : i32
    %c0_i32_0 = arith.constant 0 : i32
    %c0_i32_1 = arith.constant 0 : i32
    return %c0_i32, %c0_i32_0 : i32, i32
  }
  func.func @transform_8(%arg0: i32) -> (i32, i32) {
    %c0_i32 = arith.constant 0 : i32
    %c0_i32_0 = arith.constant 0 : i32
    %c0_i32_1 = arith.constant 0 : i32
    return %c0_i32, %c0_i32_0 : i32, i32
  }
  func.func @transform_9(%arg0: i32) -> (i32, i32) {
    %c0_i32 = arith.constant 0 : i32
    %c0_i32_0 = arith.constant 0 : i32
    %c0_i32_1 = arith.constant 0 : i32
    return %c0_i32, %c0_i32_0 : i32, i32
  }
  func.func @transform_10(%arg0: i32) -> (i32, i32) {
    %c0_i32 = arith.constant 0 : i32
    %c0_i32_0 = arith.constant 0 : i32
    %c0_i32_1 = arith.constant 0 : i32
    return %c0_i32, %c0_i32_0 : i32, i32
  }
  func.func @transform_11(%arg0: i32) -> (i32, i32) {
    %c0_i32 = arith.constant 0 : i32
    %c0_i32_0 = arith.constant 0 : i32
    %c0_i32_1 = arith.constant 0 : i32
    return %c0_i32, %c0_i32_0 : i32, i32
  }
  func.func @transform_12(%arg0: i32) -> (i32, i32) {
    %c0_i32 = arith.constant 0 : i32
    %c0_i32_0 = arith.constant 0 : i32
    %c0_i32_1 = arith.constant 0 : i32
    return %c0_i32, %c0_i32_0 : i32, i32
  }
  func.func @transform_13(%arg0: i32) -> (i32, i32) {
    %c0_i32 = arith.constant 0 : i32
    %c0_i32_0 = arith.constant 0 : i32
    %c0_i32_1 = arith.constant 0 : i32
    return %c0_i32, %c0_i32_0 : i32, i32
  }
  func.func @transform_14(%arg0: i32) -> (i32, i32) {
    %c0_i32 = arith.constant 0 : i32
    %c0_i32_0 = arith.constant 0 : i32
    %c0_i32_1 = arith.constant 0 : i32
    return %c0_i32, %c0_i32_0 : i32, i32
  }
  func.func @transform_15(%arg0: i32) -> (i32, i32) {
    %c0_i32 = arith.constant 0 : i32
    %c0_i32_0 = arith.constant 0 : i32
    %c0_i32_1 = arith.constant 0 : i32
    return %c0_i32, %c0_i32_0 : i32, i32
  }
  func.func @transform_16(%arg0: i32) -> (i32, i32) {
    %c0_i32 = arith.constant 0 : i32
    %c0_i32_0 = arith.constant 0 : i32
    %c0_i32_1 = arith.constant 0 : i32
    return %c0_i32, %c0_i32_0 : i32, i32
  }
  func.func @transform_17(%arg0: i32) -> (i32, i32) {
    %c0_i32 = arith.constant 0 : i32
    %c0_i32_0 = arith.constant 0 : i32
    %c0_i32_1 = arith.constant 0 : i32
    return %c0_i32, %c0_i32_0 : i32, i32
  }
  func.func @transform_18(%arg0: i32) -> (i32, i32) {
    %c0_i32 = arith.constant 0 : i32
    %c0_i32_0 = arith.constant 0 : i32
    %c0_i32_1 = arith.constant 0 : i32
    return %c0_i32, %c0_i32_0 : i32, i32
  }
  func.func @transform_19(%arg0: i32) -> (i32, i32) {
    %c0_i32 = arith.constant 0 : i32
    %c0_i32_0 = arith.constant 0 : i32
    return %arg0, %c0_i32 : i32, i32
  }
}

</mosaic_0001>

<bundles_post_ra>
// kernel: tpu_custom_call.1
= control target key start
LH: loop header
LB: loop body
LE: loop exit
PB: predicated region body
PF: predicated region fallthrough
CT: control target
= control target key end

     0   :  { %s2506_s0 = inlined_call_operand.vmem [shape: f32[128,28], index: 0, kind: input, shape index: {}]   ;;  %s2507_s1 = inlined_call_operand.vmem [shape: f32[28,64], index: 1, kind: input, shape index: {}]   ;;  %s2508_s2 = inlined_call_operand.vmem [shape: f32[1,64], index: 2, kind: input, shape index: {}]   ;;  %s2509_s3 = inlined_call_operand.vmem [shape: f32[64,48], index: 3, kind: input, shape index: {}]   ;;  %s2510_s4 = inlined_call_operand.vmem [shape: f32[28,48], index: 4, kind: input, shape index: {}]   ;;  %s2511_s5 = inlined_call_operand.vmem [shape: f32[1,48], index: 5, kind: input, shape index: {}]   ;;  %s2512_s6 = inlined_call_operand.vmem [shape: f32[48,32], index: 6, kind: input, shape index: {}]   ;;  %s2513_s7 = inlined_call_operand.vmem [shape: f32[1,32], index: 7, kind: input, shape index: {}]   ;;  %s2514_s8 = inlined_call_operand.vmem [shape: f32[32,8], index: 8, kind: input, shape index: {}]   ;;  %s2515_s9 = inlined_call_operand.vmem [shape: f32[1,8], index: 9, kind: input, shape index: {}]   ;;  %s2516_s10 = inlined_call_operand.vmem [shape: f32[32,128], index: 10, kind: input, shape index: {}]   ;;  %s2517_s11 = inlined_call_operand.vmem [shape: f32[8,32], index: 11, kind: input, shape index: {}]   ;;  %s2518_s12 = inlined_call_operand.vmem [shape: f32[28,32], index: 12, kind: input, shape index: {}]   ;;  %s2519_s13 = inlined_call_operand.vmem [shape: f32[1,32], index: 13, kind: input, shape index: {}]   ;;  %s2520_s14 = inlined_call_operand.vmem [shape: f32[32,48], index: 14, kind: input, shape index: {}]   ;;  %s2521_s15 = inlined_call_operand.vmem [shape: f32[1,48], index: 15, kind: input, shape index: {}]   ;;  %s2522_s16 = inlined_call_operand.vmem [shape: f32[48,128], index: 16, kind: input, shape index: {}]   ;;  %s2523_s17 = inlined_call_operand.vmem [shape: f32[28,128], index: 17, kind: input, shape index: {}]   ;;  %s2524_s18 = inlined_call_operand.vmem [shape: f32[1,128], index: 18, kind: input, shape index: {}]   ;;  %s2525_s19 = inlined_call_operand.hbm [shape: f32[128,128], index: 19, kind: output, shape index: {}]  }
   0x1   :  { %2534 = sst [smem:[#allocation10_spill]] %s2506_s0 }
   0x2   :  { %2535 = sst [smem:[#allocation11_spill]] %s2507_s1 }
   0x3   :  { %2536 = sst [smem:[#allocation12_spill]] %s2508_s2 }
   0x4   :  { %2537 = sst [smem:[#allocation13_spill]] %s2509_s3 }
   0x5   :  { %2538 = sst [smem:[#allocation14_spill]] %s2510_s4 }
   0x6   :  { %2539 = sst [smem:[#allocation15_spill]] %s2511_s5 }
   0x7   :  { %2540 = sst [smem:[#allocation16_spill]] %s2512_s6 }
   0x8   :  { %24 = vsyncpa [#allocation3], 0 }
   0x9   :  { %26 = vsyncpa [#allocation3 + $0x1], 0  ;;  %s2009_s0 = smov 0   ;;  %s2011_s30 = smov 0  }
   0xa   :  { %s2013_s20 = smov 0   ;;  %s2015_s21 = smov 0  }
   0xb LB: > { %2541 = sst [smem:[#allocation5_spill]] %s1893_s0  ;;  %s2030_s1 = sadd.s32 4294967295, %s1905_s21   ;;  %s1905_s21 = sphi %s2015_s21, %s2557_s21   ;;  %s1901_s20 = sphi %s2013_s20, %s2559_s20   ;;  %s1897_s30 = sphi %s2011_s30, %s2561_s30   ;;  %s1893_s0 = sphi %s2009_s0, %s2560_s0  }
   0xc   : > { %2542 = sst [smem:[#allocation6_spill]] %s1901_s20  ;;  %s1636_s22 = sadd.s32 4294967294, %s1905_s21  }
   0xd   : > { %s2034_s2 = sadd.s32 1, %s1905_s21   ;;  %s443_s23 = sadd.s32 1, %s1901_s20 }
   0xe   : > { %2543 = sst [smem:[#allocation7_spill]] %s2034_s2  ;;  %s440_s24 = ssub.s32 %s1905_s21, %s2034_s2 }
   0xf   : > { %p453_p0 = scmp.ne.s32.totalorder %s1901_s20, %s1897_s30  ;;  %p441_p1 = scmp.eq.s32.totalorder %s440_s24, 0 }
  0x10   : > { %p454_p2 = scmp.eq.s32.totalorder %s2030_s1, 1  ;;  %p459_p3 = scmp.ne.s32.totalorder %s1897_s30, %s1893_s0 }
  0x11   : > { %p460_p4 = scmp.eq.s32.totalorder %s1636_s22, 1  ;;  %p1639_p7 = scmp.ge.s32.totalorder %s1905_s21, 1 }
  0x12   : > { %s2045_s25 = scalar_select %p441_p1, %s1901_s20, %s443_s23  }
  0x13   : > { %p2047_p5 = por %p454_p2, %p453_p0  ;;  %p2051_p6 = por %p460_p4, %p459_p3 }
  0x14   : > { %2544 = sst [smem:[#allocation8_spill]] %s2045_s25  ;;  %p541_p8 = scmp.lt.s32.totalorder %s1905_s21, 3 }
  0x15   : > { %s2546_s26 = scalar_select %p2051_p6, 1, 0 }
  0x16   : > { %p542_p9 = pnand %p1639_p7, %p541_p8 }
  0x17   : > { %2547 = sst [smem:[#allocation9_spill]] %s2546_s26  ;;  %s1641_s24 = sshll.u32 (!%p542_p9), %s2030_s1, 3 }
  0x18   : > { %545 = sbr.rel (%p542_p9) target bundleno = 1071 (0x42f), region = 96  ;;  %s2548_s29 = sld [smem:[#allocation11_spill]] (!%p542_p9) }
  0x19   : > { %p598_p10 = scmp.lt.s32.totalorder (!%p542_p9), %s1641_s24, 15  ;;  %s2549_s23 = sld [smem:[#allocation10_spill]] (!%p542_p9) }
  0x1a   : > { %s2550_s25 = sld [smem:[#allocation13_spill]] (!%p542_p9)  ;;  %s594_s28 = sand.u32 (!%p542_p9), 1, %s1897_s30  }
  0x1b   : > { %s2551_s4 = sld [smem:[#allocation14_spill]] (!%p542_p9)  ;;  %s1764_s20 = sshll.u32 (!%p542_p9), %s2030_s1, 6 }
  0x1c   : > { %s2552_s22 = sld [smem:[#allocation12_spill]] (!%p542_p9)  ;;  %s1863_s26 = scalar_lea.hbm (!%p542_p9), %s2525_s19, 128 }
  0x1d   : > { %vm645_vm0 = vcmask 1043456   ;;  %s2563_s24 = smov (!%p598_p10, %s1641_s24), 15  ;;  %vm620_vm1 = vcmask 228352   ;;  %vm818_vm2 = vcmask 523264   ;;  %s2553_s6 = sld [smem:[#allocation16_spill]]  ;;  %vm922_vm3 = vcmask 392192  }
  0x1e   : > { %v615_v0 = vld [vmem:[%s2548_s29 + $0x18] sm:$0xf]  ;;  %v614_v1 = vld [vmem:[%s2548_s29 + $0x10] sm:$0xff]  ;;  %v613_v2 = vld [vmem:[%s2548_s29 + $0x8] sm:$0xff]  ;;  %s1642_s27 = sshll.u32 %s2563_s24, 3  ;;  %s2554_s5 = sld [smem:[#allocation15_spill]] }
  0x1f   : > { %1643 = vmatpush.msk.msra.mxu0 %vm645_vm0, %v615_v0  ;;  %v612_v3 = vld [vmem:[%s2548_s29] sm:$0xff]  ;;  %s601_s0 = scalar_lea.vmem %s2549_s23, %s1642_s27  ;;  %vm1028_vm4 = vcmask 261120   ;;  %vm1248_vm5 = vcmask 64512   ;;  %s1570_s24 = scalar_lea.hbm %s2525_s19, %s1764_s20 }
  0x20   : > { %v2074_v4 = vld [vmem:[%s601_s0] sm:$0xff]  ;;  %v2078_v5 = vld [vmem:[%s601_s0 + $0x8] sm:$0xff]  ;;  %v2082_v6 = vld [vmem:[%s601_s0 + $0x10] sm:$0xff]  ;;  %s1573_s29 = sshll.u32 %s1570_s24, 4  ;;  %s1559_s27 = scalar_lea.sflag [#allocation3], %s594_s28  ;;  %s1574_s29 = int_to_ptr.hbm [resolvable:$true] %s1573_s29 }
  0x21   : > { %662 = vmatpush.msra.mxu0 %v614_v1  ;;  %v2086_v7 = vld [vmem:[%s601_s0 + $0x18] sm:$0xff]  ;;  %v744_v9 = vld [vmem:[%s2550_s25 + $0x30] sm:$0xff]  ;;  %v743_v10 = vld [vmem:[%s2550_s25 + $0x28] sm:$0xff]  ;;  %v1660_v24 = vclamps-f32 %v2074_v4, 10.0  ;;  %v1661_v25 = vclamps-f32 %v2078_v5, 10.0  ;;  %v1662_v27 = vclamps-f32 %v2082_v6, 10.0 }
  0x22   : > { %v745_v8 = vld [vmem:[%s2550_s25 + $0x38] sm:$0xff]  ;;  %v2099_v11 = vld [vmem:[%s601_s0 + $0x20] sm:$0xff]  ;;  %v2103_v12 = vld [vmem:[%s601_s0 + $0x28] sm:$0xff]  ;;  %v1663_v32 = vclamps-f32 %v2086_v7, 10.0 }
  0x23   : > { %663 = vmatpush.msra.mxu0 %v613_v2  ;;  %851 = vmatpush.msra.mxu2 %v745_v8  ;;  %v2107_v13 = vld [vmem:[%s601_s0 + $0x30] sm:$0xff]  ;;  %v2111_v14 = vld [vmem:[%s601_s0 + $0x38] sm:$0xff]  ;;  %v742_v15 = vld [vmem:[%s2550_s25 + $0x20] sm:$0xff]  ;;  %v1664_v38 = vclamps-f32 %v2099_v11, 10.0  ;;  %v1665_v44 = vclamps-f32 %v2103_v12, 10.0 }
  0x24   : > { %v741_v16 = vld [vmem:[%s2550_s25 + $0x18] sm:$0xff]  ;;  %v740_v17 = vld [vmem:[%s2550_s25 + $0x10] sm:$0xff]  ;;  %v739_v18 = vld [vmem:[%s2550_s25 + $0x8] sm:$0xff]  ;;  %v1666_v50 = vclamps-f32 %v2107_v13, 10.0  ;;  %v1667_v57 = vclamps-f32 %v2111_v14, 10.0 }
  0x25   : > { %664 = vmatpush.msra.mxu0 %v612_v3  ;;  %852 = vmatpush.msra.mxu2 %v744_v9  ;;  %v749_v19 = vld [vmem:[%s2551_s4 + $0x18] sm:$0xf]  ;;  %v738_v20 = vld [vmem:[%s2550_s25] sm:$0xff]  ;;  %v748_v21 = vld [vmem:[%s2551_s4 + $0x10] sm:$0xff] }
  0x26   : > { %1644 = vmatmul.msk.f32.vlgmr.msra.gmra.mxu0 %vm620_vm1, %v2074_v4  ;;  %1668 = vmatpush.msk.msra.mxu1 %vm645_vm0, %v749_v19  ;;  %v747_v22 = vld [vmem:[%s2551_s4 + $0x8] sm:$0xff]  ;;  %v746_v23 = vld [vmem:[%s2551_s4] sm:$0xff]  ;;  %v915_v58 = vld [vmem:[%s2553_s6 + $0x18] sm:$0xff] }
  0x27   : > { %853 = vmatpush.msra.mxu2 %v743_v10  ;;  %v2150_v26 = vld [vmem:[%s2552_s22] ss:$0 sm:$0xff]  ;;  %v917_v54 = vld [vmem:[%s2553_s6 + $0x28] sm:$0xff]  ;;  %v914_v60 = vld [vmem:[%s2553_s6 + $0x10] sm:$0xff]  ;;  %s1640_s22 = sshll.u32 %s594_s28, 6 }
  0x28   : > { %790 = vmatpush.msra.mxu1 %v748_v21  ;;  %v916_v55 = vld [vmem:[%s2553_s6 + $0x20] sm:$0xff]  ;;  %1765 = vmatpush.msra.mxu3 %v917_v54  ;;  %v913_v21 = vld [vmem:[%s2553_s6 + $0x8] sm:$0xff]  ;;  %s2455_s23 = scalar_lea.vmem [#allocation2], %s1640_s22  ;;  %s1857_s22 = sshra.s32 %s1574_s29, 4  ;;  %s1858_s22 = int_to_ptr.hbm [resolvable:$true] %s1857_s22 }
  0x29   : > { %854 = vmatpush.msra.mxu2 %v742_v15  ;;  %s1571_s0 = sshll.u32 %s2455_s23, 4  ;;  %s1859_s1 = scalar_lea.hbm %s1858_s22, 64  ;;  %s1572_s0 = int_to_ptr.vmem [resolvable:$true] %s1571_s0 }
  0x2a   : > { %791 = vmatpush.msra.mxu1 %v747_v22  ;;  %1766 = vmatpush.msra.mxu3 %v916_v55  ;;  %v912_v22 = vld [vmem:[%s2553_s6] sm:$0xff]  ;;  %p1860_p11 = scmp.ne.s32.totalorder %s1858_s22, %s1859_s1  ;;  %p1864_p0 = scmp.lt.s32.totalorder %s1858_s22, %s2525_s19 }
  0x2b   : > { %855 = vmatpush.msra.mxu2 %v741_v16  ;;  %p1865_p1 = scmp.lt.s32.totalorder %s1863_s26, %s1859_s1 }
  0x2c   : > { %792 = vmatpush.msra.mxu1 %v746_v23  ;;  %1767 = vmatpush.msra.mxu3 %v915_v58  ;;  %p1861_p12 = pnand %p1860_p11, %p2047_p5 }
  0x2d   : > { %856 = vmatpush.msra.mxu2 %v740_v17  ;;  %1669 = vmatmul.msk.f32.vlgmr.msra.gmra.mxu1 %vm620_vm1, %v1660_v24  ;;  %p1866_p2 = por %p1865_p1, %p1864_p0 }
  0x2e   : > { %1645 = vmatmul.msk.f32.gmra.mxu0 %vm620_vm1, %v2078_v5  ;;  %1768 = vmatpush.msra.mxu3 %v914_v60  ;;  %p1862_p13 = pneg %p1861_p12 }
  0x2f   : > { %857 = vmatpush.msra.mxu2 %v739_v18 }
  0x30   : > { %1769 = vmatpush.msra.mxu3 %v913_v21  ;;  %p1867_p3 = pnand %p1866_p2, %p1862_p13 }
  0x31   : > { %858 = vmatpush.msra.mxu2 %v738_v20 }
  0x32   : > { %1770 = vmatpush.msra.mxu3 %v912_v22 }
  0x33   : > { %957 = vmatpush.msrb.mxu2 %v917_v54 }
  0x35   : > { %1670 = vmatmul.msk.f32.gmra.mxu1 %vm620_vm1, %v1661_v25  ;;  %958 = vmatpush.msrb.mxu2 %v916_v55  ;;  %v2201_v25 = vld [vmem:[%s2554_s5] ss:$0 sm:$0xff]  ;;  %v1022_v55 = vld [vmem:[%s2516_s10 + $0x10] sm:$0xff] }
  0x36   : > { %1646 = vmatmul.msk.f32.gmra.mxu0 %vm620_vm1, %v2082_v6 }
  0x37   : > { %959 = vmatpush.msrb.mxu2 %v915_v58 }
  0x39   : > { %960 = vmatpush.msrb.mxu2 %v914_v60 }
  0x3b   : > { %961 = vmatpush.msrb.mxu2 %v913_v21  ;;  %v1021_v21 = vld [vmem:[%s2516_s10 + $0x8] sm:$0xff] }
  0x3d   : > { %1671 = vmatmul.msk.f32.gmra.mxu1 %vm620_vm1, %v1662_v27  ;;  %962 = vmatpush.msrb.mxu2 %v912_v22  ;;  %v1094_v22 = vld [vmem:[%s2514_s8] sm:$0xff] }
  0x3e   : > { %1647 = vmatmul.msk.f32.gmra.mxu0 %vm620_vm1, %v2086_v7 }
  0x45   : > { %1672 = vmatmul.msk.f32.gmra.mxu1 %vm620_vm1, %v1663_v32 }
  0x46   : > { %1648 = vmatmul.msk.f32.gmra.mxu0 %vm620_vm1, %v2099_v11 }
  0x4d   : > { %1673 = vmatmul.msk.f32.gmra.mxu1 %vm620_vm1, %v1664_v38 }
  0x4e   : > { %1649 = vmatmul.msk.f32.gmra.mxu0 %vm620_vm1, %v2103_v12 }
  0x55   : > { %1674 = vmatmul.msk.f32.gmra.mxu1 %vm620_vm1, %v1665_v44 }
  0x56   : > { %1650 = vmatmul.msk.f32.gmra.mxu0 %vm620_vm1, %v2107_v13 }
  0x5d   : > { %1675 = vmatmul.msk.f32.gmra.mxu1 %vm620_vm1, %v1666_v50 }
  0x5e   : > { %1651 = vmatmul.msk.f32.gmra.mxu0 %vm620_vm1, %v2111_v14 }
  0x65   : > { %1676 = vmatmul.msk.f32.gmra.mxu1 %vm620_vm1, %v1667_v57  ;;  %v1095_v57 = vld [vmem:[%s2514_s8 + $0x8] sm:$0xff] }
  0xa3   : > { %v666_v28 = vpop.f32.mrf.mxu0 }
  0xa4   : > { %v667_v29 = vadd.f32 %v2150_v26, %v666_v28 }
  0xa6   : > { %v690_v30 = vmul.f32 0.2, %v667_v29 }
  0xa8   : > { %v698_v31 = vmax.f32 %v667_v29, %v690_v30 }
  0xaa   : > { %v1652_v33 = vclamps-f32 %v698_v31, 10.0  ;;  %v794_v23 = vpop.f32.mrf.mxu1 }
  0xab   : > { %v669_v34 = vpop.f32.mrf.mxu0 }
  0xac   : > { %v670_v35 = vadd.f32 %v2150_v26, %v669_v34  ;;  %1677 = vmatmul.msk.f32.vlgmr.msra.gmra.mxu2 %vm818_vm2, %v1652_v33 }
  0xae   : > { %v691_v36 = vmul.f32 0.2, %v670_v35 }
  0xb0   : > { %v699_v37 = vmax.f32 %v670_v35, %v691_v36 }
  0xb2   : > { %v1653_v39 = vclamps-f32 %v699_v37, 10.0  ;;  %v797_v24 = vpop.f32.mrf.mxu1 }
  0xb3   : > { %v672_v40 = vpop.f32.mrf.mxu0 }
  0xb4   : > { %v673_v41 = vadd.f32 %v2150_v26, %v672_v40  ;;  %1678 = vmatmul.msk.f32.gmra.mxu2 %vm818_vm2, %v1653_v39 }
  0xb6   : > { %v692_v42 = vmul.f32 0.2, %v673_v41 }
  0xb8   : > { %v700_v43 = vmax.f32 %v673_v41, %v692_v42 }
  0xba   : > { %v1654_v45 = vclamps-f32 %v700_v43, 10.0  ;;  %v800_v29 = vpop.f32.mrf.mxu1 }
  0xbb   : > { %v675_v46 = vpop.f32.mrf.mxu0 }
  0xbc   : > { %v676_v47 = vadd.f32 %v2150_v26, %v675_v46  ;;  %1679 = vmatmul.msk.f32.gmra.mxu2 %vm818_vm2, %v1654_v45 }
  0xbe   : > { %v693_v48 = vmul.f32 0.2, %v676_v47 }
  0xc0   : > { %v701_v49 = vmax.f32 %v676_v47, %v693_v48 }
  0xc2   : > { %v1655_v51 = vclamps-f32 %v701_v49, 10.0  ;;  %v803_v36 = vpop.f32.mrf.mxu1 }
  0xc3   : > { %v678_v52 = vpop.f32.mrf.mxu0 }
  0xc4   : > { %v679_v53 = vadd.f32 %v2150_v26, %v678_v52  ;;  %1680 = vmatmul.msk.f32.gmra.mxu2 %vm818_vm2, %v1655_v51  ;;  %v1097_v51 = vld [vmem:[%s2514_s8 + $0x18] sm:$0xff]  ;;  %v1096_v52 = vld [vmem:[%s2514_s8 + $0x10] sm:$0xff] }
  0xc5   : > { %1114 = vmatpush.msrb.mxu1 %v1097_v51 }
  0xc6   : > { %v694_v56 = vmul.f32 0.2, %v679_v53 }
  0xc7   : > { %1115 = vmatpush.msrb.mxu1 %v1096_v52 }
  0xc8   : > { %v702_v59 = vmax.f32 %v679_v53, %v694_v56  ;;  %v1023_v53 = vld [vmem:[%s2516_s10 + $0x18] sm:$0xff] }
  0xc9   : > { %1065 = vmatpush.msrb.mxu0 %v1023_v53  ;;  %1771 = vmatpush.msra.mxu2 %v1023_v53 }
  0xca   : > { %v1656_v61 = vclamps-f32 %v702_v59, 10.0  ;;  %v806_v44 = vpop.f32.mrf.mxu1  ;;  %1116 = vmatpush.msrb.mxu1 %v1095_v57 }
  0xcb   : > { %v681_v62 = vpop.f32.mrf.mxu0  ;;  %1066 = vmatpush.msrb.mxu0 %v1022_v55  ;;  %1772 = vmatpush.msra.mxu2 %v1022_v55 }
  0xcc   : > { %v682_v63 = vadd.f32 %v2150_v26, %v681_v62  ;;  %1681 = vmatmul.msk.f32.gmra.mxu2 %vm818_vm2, %v1656_v61  ;;  %1117 = vmatpush.msrb.mxu1 %v1094_v22 }
  0xcd   : > { %1067 = vmatpush.msrb.mxu0 %v1021_v21  ;;  %1773 = vmatpush.msra.mxu2 %v1021_v21 }
  0xce   : > { %v695_v0 = vmul.f32 0.2, %v682_v63 }
  0xd0   : > { %v703_v1 = vmax.f32 %v682_v63, %v695_v0 }
  0xd2   : > { %v1657_v2 = vclamps-f32 %v703_v1, 10.0  ;;  %v809_v54 = vpop.f32.mrf.mxu1 }
  0xd3   : > { %v684_v3 = vpop.f32.mrf.mxu0 }
  0xd4   : > { %v685_v8 = vadd.f32 %v2150_v26, %v684_v3  ;;  %1682 = vmatmul.msk.f32.gmra.mxu2 %vm818_vm2, %v1657_v2 }
  0xd6   : > { %v696_v9 = vmul.f32 0.2, %v685_v8 }
  0xd8   : > { %v704_v10 = vmax.f32 %v685_v8, %v696_v9 }
  0xda   : > { %v1658_v15 = vclamps-f32 %v704_v10, 10.0  ;;  %v812_v63 = vpop.f32.mrf.mxu1 }
  0xdb   : > { %v687_v16 = vpop.f32.mrf.mxu0 }
  0xdc   : > { %v688_v17 = vadd.f32 %v2150_v26, %v687_v16  ;;  %1683 = vmatmul.msk.f32.gmra.mxu2 %vm818_vm2, %v1658_v15 }
  0xde   : > { %v697_v18 = vmul.f32 0.2, %v688_v17 }
  0xe0   : > { %v705_v19 = vmax.f32 %v688_v17, %v697_v18 }
  0xe2   : > { %v1659_v20 = vclamps-f32 %v705_v19, 10.0  ;;  %v815_v10 = vpop.f32.mrf.mxu1 }
  0xe4   : > { %1684 = vmatmul.msk.f32.gmra.mxu2 %vm818_vm2, %v1659_v20 }
 0x12f   : > { %v860_v26 = vpop.f32.mrf.mxu2 }
 0x130   : > { %v861_v27 = vadd.f32 %v860_v26, %v794_v23  ;;  %v1020_v23 = vld [vmem:[%s2516_s10] sm:$0xff] }
 0x131   : > { %1068 = vmatpush.msrb.mxu0 %v1020_v23  ;;  %1774 = vmatpush.msra.mxu2 %v1020_v23 }
 0x132   : > { %v888_v28 = vadd.f32 %v2201_v25, %v861_v27 }
 0x134   : > { %v896_v30 = vmul.f32 0.2, %v888_v28 }
 0x136   : > { %v904_v31 = vmax.f32 %v888_v28, %v896_v30 }
 0x137   : > { %v863_v32 = vpop.f32.mrf.mxu2 }
 0x138   : > { %v864_v33 = vadd.f32 %v863_v32, %v797_v24  ;;  %1685 = vmatmul.msk.f32.vlgmr.msrb.gmra.mxu2 %vm922_vm3, %v904_v31  ;;  %v1822_v24 = vld [vmem:[%s2513_s7] ss:$0 sm:$0xff] }
 0x139   : > { %1775 = vmatpush.msrb.mxu2 %v1097_v51 }
 0x13a   : > { %v889_v34 = vadd.f32 %v2201_v25, %v864_v33 }
 0x13b   : > { %1776 = vmatpush.msrb.mxu2 %v1096_v52  ;;  %v1203_v52 = vld [vmem:[%s2518_s12 + $0x18] sm:$0xf] }
 0x13c   : > { %v897_v35 = vmul.f32 0.2, %v889_v34  ;;  %1717 = vmatpush.msk.msrb.mxu3 %vm645_vm0, %v1203_v52 }
 0x13d   : > { %1777 = vmatpush.msrb.mxu2 %v1095_v57 }
 0x13e   : > { %v905_v37 = vmax.f32 %v889_v34, %v897_v35 }
 0x13f   : > { %v866_v38 = vpop.f32.mrf.mxu2  ;;  %1778 = vmatpush.msrb.mxu2 %v1094_v22 }
 0x140   : > { %v867_v39 = vadd.f32 %v866_v38, %v800_v29  ;;  %1686 = vmatmul.msk.f32.gmra.mxu2 %vm922_vm3, %v905_v37 }
 0x142   : > { %v890_v40 = vadd.f32 %v2201_v25, %v867_v39 }
 0x144   : > { %v898_v41 = vmul.f32 0.2, %v890_v40 }
 0x146   : > { %v906_v42 = vmax.f32 %v890_v40, %v898_v41 }
 0x147   : > { %v869_v43 = vpop.f32.mrf.mxu2 }
 0x148   : > { %v870_v45 = vadd.f32 %v869_v43, %v803_v36  ;;  %1687 = vmatmul.msk.f32.vlgmr.msra.gmra.mxu3 %vm922_vm3, %v906_v42 }
 0x14a   : > { %v891_v46 = vadd.f32 %v2201_v25, %v870_v45 }
 0x14c   : > { %v899_v47 = vmul.f32 0.2, %v891_v46 }
 0x14e   : > { %v907_v48 = vmax.f32 %v891_v46, %v899_v47 }
 0x14f   : > { %v872_v49 = vpop.f32.mrf.mxu2 }
 0x150   : > { %v873_v50 = vadd.f32 %v872_v49, %v806_v44  ;;  %1688 = vmatmul.msk.f32.gmra.mxu3 %vm922_vm3, %v907_v48 }
 0x152   : > { %v892_v56 = vadd.f32 %v2201_v25, %v873_v50 }
 0x154   : > { %v900_v58 = vmul.f32 0.2, %v892_v56 }
 0x156   : > { %v908_v59 = vmax.f32 %v892_v56, %v900_v58 }
 0x157   : > { %v875_v60 = vpop.f32.mrf.mxu2 }
 0x158   : > { %v876_v61 = vadd.f32 %v875_v60, %v809_v54  ;;  %1689 = vmatmul.msk.f32.gmra.mxu3 %vm922_vm3, %v908_v59 }
 0x15a   : > { %v893_v62 = vadd.f32 %v2201_v25, %v876_v61 }
 0x15c   : > { %v901_v0 = vmul.f32 0.2, %v893_v62 }
 0x15e   : > { %v909_v1 = vmax.f32 %v893_v62, %v901_v0 }
 0x15f   : > { %v878_v2 = vpop.f32.mrf.mxu2 }
 0x160   : > { %v879_v3 = vadd.f32 %v878_v2, %v812_v63  ;;  %1690 = vmatmul.msk.f32.gmra.mxu3 %vm922_vm3, %v909_v1  ;;  %v1202_v2 = vld [vmem:[%s2518_s12 + $0x10] sm:$0xff] }
 0x161   : > { %1220 = vmatpush.msrb.mxu3 %v1202_v2 }
 0x162   : > { %v894_v8 = vadd.f32 %v2201_v25, %v879_v3  ;;  %v1201_v3 = vld [vmem:[%s2518_s12 + $0x8] sm:$0xff] }
 0x163   : > { %1221 = vmatpush.msrb.mxu3 %v1201_v3 }
 0x164   : > { %v902_v9 = vmul.f32 0.2, %v894_v8 }
 0x166   : > { %v910_v15 = vmax.f32 %v894_v8, %v902_v9  ;;  %v1200_v8 = vld [vmem:[%s2518_s12] sm:$0xff] }
 0x167   : > { %v881_v16 = vpop.f32.mrf.mxu2  ;;  %v1199_v9 = vld [vmem:[%s2517_s11] sm:$0xff]  ;;  %1222 = vmatpush.msrb.mxu3 %v1200_v8 }
 0x168   : > { %v882_v17 = vadd.f32 %v881_v16, %v815_v10  ;;  %1691 = vmatmul.msk.f32.gmra.mxu3 %vm922_vm3, %v910_v15  ;;  %v2283_v10 = vld [vmem:[%s2515_s9] ss:$0 sm:$0xff] }
 0x16a   : > { %v895_v18 = vadd.f32 %v2201_v25, %v882_v17 }
 0x16c   : > { %v903_v19 = vmul.f32 0.2, %v895_v18 }
 0x16e   : > { %v911_v20 = vmax.f32 %v895_v18, %v903_v19 }
 0x170   : > { %1692 = vmatmul.msk.f32.gmra.mxu3 %vm922_vm3, %v911_v20 }
 0x178   : > { %1718 = vmatmul.msk.f32.vlgmr.msrb.gmra.mxu3 %vm620_vm1, %v2074_v4 }
 0x180   : > { %1719 = vmatmul.msk.f32.gmra.mxu3 %vm620_vm1, %v2078_v5 }
 0x188   : > { %1720 = vmatmul.msk.f32.gmra.mxu3 %vm620_vm1, %v2082_v6 }
 0x190   : > { %1721 = vmatmul.msk.f32.gmra.mxu3 %vm620_vm1, %v2086_v7 }
 0x198   : > { %1722 = vmatmul.msk.f32.gmra.mxu3 %vm620_vm1, %v2099_v11 }
 0x1a0   : > { %1723 = vmatmul.msk.f32.gmra.mxu3 %vm620_vm1, %v2103_v12 }
 0x1a8   : > { %1724 = vmatmul.msk.f32.gmra.mxu3 %vm620_vm1, %v2107_v13 }
 0x1b0   : > { %1725 = vmatmul.msk.f32.gmra.mxu3 %vm620_vm1, %v2111_v14 }
 0x1bb   : > { %v964_v25 = vpop.f32.mrf.mxu2 }
 0x1bc   : > { %v965_v26 = vadd.f32 %v1822_v24, %v964_v25 }
 0x1be   : > { %v988_v27 = vmul.f32 0.2, %v965_v26 }
 0x1c0   : > { %v996_v28 = vmax.f32 %v965_v26, %v988_v27  ;;  %v2294_v27 = vld [vmem:[%s2524_s18] ss:$0 sm:$0xff] }
 0x1c2   : > { %v1693_v29 = vclamps-f32 %v996_v28, 10.0 }
 0x1c3   : > { %v967_v30 = vpop.f32.mrf.mxu2 }
 0x1c4   : > { %v968_v31 = vadd.f32 %v1822_v24, %v967_v30  ;;  %1701 = vmatmul.msk.f32.vlgmr.msrb.gmra.mxu0 %vm1028_vm4, %v1693_v29  ;;  %1709 = vmatmul.msk.f32.vlgmr.msrb.gmra.mxu1 %vm1028_vm4, %v1693_v29 }
 0x1c6   : > { %v989_v32 = vmul.f32 0.2, %v968_v31 }
 0x1c8   : > { %v997_v33 = vmax.f32 %v968_v31, %v989_v32 }
 0x1ca   : > { %v1694_v34 = vclamps-f32 %v997_v33, 10.0 }
 0x1cb   : > { %v970_v35 = vpop.f32.mrf.mxu3 }
 0x1cc   : > { %v971_v36 = vadd.f32 %v1822_v24, %v970_v35  ;;  %1702 = vmatmul.msk.f32.gmra.mxu0 %vm1028_vm4, %v1694_v34  ;;  %1710 = vmatmul.msk.f32.gmra.mxu1 %vm1028_vm4, %v1694_v34 }
 0x1ce   : > { %v990_v37 = vmul.f32 0.2, %v971_v36 }
 0x1d0   : > { %v998_v38 = vmax.f32 %v971_v36, %v990_v37 }
 0x1d2   : > { %v1695_v39 = vclamps-f32 %v998_v38, 10.0 }
 0x1d3   : > { %v973_v40 = vpop.f32.mrf.mxu3 }
 0x1d4   : > { %v974_v41 = vadd.f32 %v1822_v24, %v973_v40  ;;  %1703 = vmatmul.msk.f32.gmra.mxu0 %vm1028_vm4, %v1695_v39  ;;  %1711 = vmatmul.msk.f32.gmra.mxu1 %vm1028_vm4, %v1695_v39 }
 0x1d6   : > { %v991_v42 = vmul.f32 0.2, %v974_v41 }
 0x1d8   : > { %v999_v43 = vmax.f32 %v974_v41, %v991_v42 }
 0x1da   : > { %v1696_v44 = vclamps-f32 %v999_v43, 10.0 }
 0x1db   : > { %v976_v45 = vpop.f32.mrf.mxu3 }
 0x1dc   : > { %v977_v46 = vadd.f32 %v1822_v24, %v976_v45  ;;  %1704 = vmatmul.msk.f32.gmra.mxu0 %vm1028_vm4, %v1696_v44  ;;  %1712 = vmatmul.msk.f32.gmra.mxu1 %vm1028_vm4, %v1696_v44 }
 0x1de   : > { %v992_v47 = vmul.f32 0.2, %v977_v46 }
 0x1e0   : > { %v1000_v48 = vmax.f32 %v977_v46, %v992_v47 }
 0x1e2   : > { %v1697_v49 = vclamps-f32 %v1000_v48, 10.0 }
 0x1e3   : > { %v979_v50 = vpop.f32.mrf.mxu3 }
 0x1e4   : > { %v980_v51 = vadd.f32 %v1822_v24, %v979_v50  ;;  %1705 = vmatmul.msk.f32.gmra.mxu0 %vm1028_vm4, %v1697_v49  ;;  %1713 = vmatmul.msk.f32.gmra.mxu1 %vm1028_vm4, %v1697_v49 }
 0x1e6   : > { %v993_v53 = vmul.f32 0.2, %v980_v51 }
 0x1e8   : > { %v1001_v54 = vmax.f32 %v980_v51, %v993_v53 }
 0x1ea   : > { %v1698_v55 = vclamps-f32 %v1001_v54, 10.0 }
 0x1eb   : > { %v982_v56 = vpop.f32.mrf.mxu3 }
 0x1ec   : > { %v983_v57 = vadd.f32 %v1822_v24, %v982_v56  ;;  %1706 = vmatmul.msk.f32.gmra.mxu0 %vm1028_vm4, %v1698_v55  ;;  %1714 = vmatmul.msk.f32.gmra.mxu1 %vm1028_vm4, %v1698_v55 }
 0x1ee   : > { %v994_v58 = vmul.f32 0.2, %v983_v57 }
 0x1f0   : > { %v1002_v59 = vmax.f32 %v983_v57, %v994_v58 }
 0x1f2   : > { %v1699_v60 = vclamps-f32 %v1002_v59, 10.0 }
 0x1f3   : > { %v985_v61 = vpop.f32.mrf.mxu3 }
 0x1f4   : > { %v986_v62 = vadd.f32 %v1822_v24, %v985_v61  ;;  %1707 = vmatmul.msk.f32.gmra.mxu0 %vm1028_vm4, %v1699_v60  ;;  %1715 = vmatmul.msk.f32.gmra.mxu1 %vm1028_vm4, %v1699_v60 }
 0x1f6   : > { %v995_v63 = vmul.f32 0.2, %v986_v62 }
 0x1f8   : > { %v1003_v0 = vmax.f32 %v986_v62, %v995_v63 }
 0x1fa   : > { %v1700_v1 = vclamps-f32 %v1003_v0, 10.0 }
 0x1fc   : > { %1708 = vmatmul.msk.f32.vlgmr.msra.gmra.mxu2 %vm1028_vm4, %v1700_v1 }
 0x1fd   : > { %1288 = vmatpush.msra.mxu2 %v1199_v9 }
 0x204   : > { %1716 = vmatmul.msk.f32.vlgmr.msrb.gmra.mxu2 %vm1028_vm4, %v1700_v1 }
 0x241   : > { %v1119_v15 = vpop.f32.mrf.mxu1  ;;  %v1070_v17 = vpop.f32.mrf.mxu0 }
 0x242   : > { %v1120_v16 = vadd.f32 %v2283_v10, %v1119_v15  ;;  %v2300_v33 = vadd.f32 %v2294_v27, %v1070_v17 }
 0x244   : > { %v1143_v18 = vmax.f32 %v1120_v16, -5.0 }
 0x246   : > { %v1151_v19 = vmin.f32 %v1143_v18, 2.0 }
 0x248   : > { %v1159_v20 = vmul.f32 0.5, %v1151_v19 }
 0x249   : > { %v1122_v21 = vpop.f32.mrf.mxu1  ;;  %v1073_v25 = vpop.f32.mrf.mxu0 }
 0x24a   : > { %v1167_v22 = vmul.f32 1.442695, %v1159_v20  ;;  %v1123_v23 = vadd.f32 %v2283_v10, %v1122_v21  ;;  %v2309_v44 = vadd.f32 %v2294_v27, %v1073_v25 }
 0x24c   : > { %1827 = vpow2.f32 %v1167_v22  ;;  %v1144_v24 = vmax.f32 %v1123_v23, -5.0 }
 0x24e   : > { %v1152_v26 = vmin.f32 %v1144_v24, 2.0 }
 0x250   : > { %v1160_v28 = vmul.f32 0.5, %v1152_v26 }
 0x251   : > { %v1125_v29 = vpop.f32.mrf.mxu1  ;;  %v1076_v38 = vpop.f32.mrf.mxu0 }
 0x252   : > { %v1828_v30 = vpop.eup %1827  ;;  %v1169_v31 = vmul.f32 1.442695, %v1160_v28  ;;  %v1126_v32 = vadd.f32 %v2283_v10, %v1125_v29  ;;  %v2318_v55 = vadd.f32 %v2294_v27, %v1076_v38  ;;  %v1335_v38 = vld [vmem:[%s2520_s14 + $0x8] sm:$0xff] }
 0x253   : > { %v1183_v34 = vmul.f32 %v1828_v30, %v2074_v4 }
 0x254   : > { %1829 = vpow2.f32 %v1169_v31  ;;  %v1145_v35 = vmax.f32 %v1126_v32, -5.0 }
 0x255   : > { %v1191_v36 = vadd.f32 %v1183_v34, %v2300_v33 }
 0x256   : > { %v1153_v37 = vmin.f32 %v1145_v35, 2.0  ;;  %v1337_v35 = vld [vmem:[%s2520_s14 + $0x18] sm:$0xff] }
 0x257   : > { %1726 = vmatmul.msk.f32.vlgmr.msra.gmra.mxu2 %vm1248_vm5, %v1191_v36  ;;  %v1336_v36 = vld [vmem:[%s2520_s14 + $0x10] sm:$0xff]  ;;  %1378 = vmatpush.msra.mxu0 %v1337_v35 }
 0x258   : > { %v1161_v39 = vmul.f32 0.5, %v1153_v37 }
 0x259   : > { %v1128_v40 = vpop.f32.mrf.mxu1  ;;  %v1079_v52 = vpop.f32.mrf.mxu0  ;;  %1379 = vmatpush.msra.mxu0 %v1336_v36  ;;  %v1497_v36 = vld [vmem:[%s2523_s17 + $0x18] sm:$0xf] }
 0x25a   : > { %v1830_v41 = vpop.eup %1829  ;;  %v1171_v42 = vmul.f32 1.442695, %v1161_v39  ;;  %v1129_v43 = vadd.f32 %v2283_v10, %v1128_v40  ;;  %v2327_v1 = vadd.f32 %v2294_v27, %v1079_v52  ;;  %1750 = vmatpush.msk.msra.mxu3 %vm645_vm0, %v1497_v36 }
 0x25b   : > { %v1184_v45 = vmul.f32 %v1830_v41, %v2078_v5  ;;  %1380 = vmatpush.msra.mxu0 %v1335_v38  ;;  %v1496_v38 = vld [vmem:[%s2523_s17 + $0x10] sm:$0xff] }
 0x25c   : > { %1831 = vpow2.f32 %v1171_v42  ;;  %v1146_v46 = vmax.f32 %v1129_v43, -5.0  ;;  %1514 = vmatpush.msra.mxu3 %v1496_v38 }
 0x25d   : > { %v1192_v47 = vadd.f32 %v1184_v45, %v2309_v44 }
 0x25e   : > { %v1154_v48 = vmin.f32 %v1146_v46, 2.0 }
 0x25f   : > { %1727 = vmatmul.msk.f32.gmra.mxu2 %vm1248_vm5, %v1192_v47 }
 0x260   : > { %v1162_v49 = vmul.f32 0.5, %v1154_v48 }
 0x261   : > { %v1131_v50 = vpop.f32.mrf.mxu1  ;;  %v1082_v3 = vpop.f32.mrf.mxu0 }
 0x262   : > { %v1832_v51 = vpop.eup %1831  ;;  %v1173_v53 = vmul.f32 1.442695, %v1162_v49  ;;  %v1132_v54 = vadd.f32 %v2283_v10, %v1131_v50  ;;  %v2336_v21 = vadd.f32 %v2294_v27, %v1082_v3 }
 0x263   : > { %v1185_v56 = vmul.f32 %v1832_v51, %v2082_v6 }
 0x264   : > { %1833 = vpow2.f32 %v1173_v53  ;;  %v1147_v57 = vmax.f32 %v1132_v54, -5.0 }
 0x265   : > { %v1193_v58 = vadd.f32 %v1185_v56, %v2318_v55  ;;  %v1334_v56 = vld [vmem:[%s2520_s14] sm:$0xff] }
 0x266   : > { %v1155_v59 = vmin.f32 %v1147_v57, 2.0  ;;  %1381 = vmatpush.msra.mxu0 %v1334_v56 }
 0x267   : > { %1728 = vmatmul.msk.f32.gmra.mxu2 %vm1248_vm5, %v1193_v58  ;;  %v2375_v58 = vld [vmem:[%s2519_s13] ss:$0 sm:$0xff] }
 0x268   : > { %v1163_v60 = vmul.f32 0.5, %v1155_v59 }
 0x269   : > { %v1134_v61 = vpop.f32.mrf.mxu1  ;;  %v1085_v25 = vpop.f32.mrf.mxu0 }
 0x26a   : > { %v1834_v62 = vpop.eup %1833  ;;  %v1175_v63 = vmul.f32 1.442695, %v1163_v60  ;;  %v1135_v0 = vadd.f32 %v2283_v10, %v1134_v61  ;;  %v2342_v31 = vadd.f32 %v2294_v27, %v1085_v25 }
 0x26b   : > { %v1186_v2 = vmul.f32 %v1834_v62, %v2086_v7 }
 0x26c   : > { %1835 = vpow2.f32 %v1175_v63  ;;  %v1148_v8 = vmax.f32 %v1135_v0, -5.0 }
 0x26d   : > { %v1194_v9 = vadd.f32 %v1186_v2, %v2327_v1 }
 0x26e   : > { %v1156_v15 = vmin.f32 %v1148_v8, 2.0 }
 0x26f   : > { %1729 = vmatmul.msk.f32.gmra.mxu2 %vm1248_vm5, %v1194_v9 }
 0x270   : > { %v1164_v16 = vmul.f32 0.5, %v1156_v15 }
 0x271   : > { %v1137_v17 = vpop.f32.mrf.mxu1  ;;  %v1088_v39 = vpop.f32.mrf.mxu0 }
 0x272   : > { %v1836_v18 = vpop.eup %1835  ;;  %v1177_v19 = vmul.f32 1.442695, %v1164_v16  ;;  %v1138_v20 = vadd.f32 %v2283_v10, %v1137_v17  ;;  %v2357_v41 = vadd.f32 %v2294_v27, %v1088_v39 }
 0x273   : > { %v1187_v22 = vmul.f32 %v1836_v18, %v2099_v11 }
 0x274   : > { %1837 = vpow2.f32 %v1177_v19  ;;  %v1149_v23 = vmax.f32 %v1138_v20, -5.0 }
 0x275   : > { %v1195_v24 = vadd.f32 %v1187_v22, %v2336_v21 }
 0x276   : > { %v1157_v26 = vmin.f32 %v1149_v23, 2.0 }
 0x277   : > { %1730 = vmatmul.msk.f32.gmra.mxu2 %vm1248_vm5, %v1195_v24 }
 0x278   : > { %v1165_v28 = vmul.f32 0.5, %v1157_v26 }
 0x27a   : > { %v1838_v29 = vpop.eup %1837  ;;  %v1179_v30 = vmul.f32 1.442695, %v1165_v28 }
 0x27b   : > { %v1188_v32 = vmul.f32 %v1838_v29, %v2103_v12 }
 0x27c   : > { %1839 = vpow2.f32 %v1179_v30 }
 0x27d   : > { %v1196_v34 = vadd.f32 %v1188_v32, %v2342_v31 }
 0x27f   : > { %v1091_v37 = vpop.f32.mrf.mxu2  ;;  %1731 = vmatmul.msk.f32.gmra.mxu2 %vm1248_vm5, %v1196_v34 }
 0x280   : > { %v2364_v52 = vadd.f32 %v2294_v27, %v1091_v37  ;;  %v1420_v37 = vld [vmem:[%s2522_s16 + $0x28] sm:$0xff] }
 0x281   : > { %1455 = vmatpush.msra.mxu1 %v1420_v37 }
 0x282   : > { %v1840_v40 = vpop.eup %1839 }
 0x283   : > { %v1189_v42 = vmul.f32 %v1840_v40, %v2107_v13  ;;  %v1419_v40 = vld [vmem:[%s2522_s16 + $0x20] sm:$0xff] }
 0x284   : > { %1456 = vmatpush.msra.mxu1 %v1419_v40 }
 0x285   : > { %v1197_v43 = vadd.f32 %v1189_v42, %v2357_v41  ;;  %v1418_v42 = vld [vmem:[%s2522_s16 + $0x18] sm:$0xff] }
 0x286   : > { %1457 = vmatpush.msra.mxu1 %v1418_v42 }
 0x287   : > { %v1140_v45 = vpop.f32.mrf.mxu2  ;;  %1732 = vmatmul.msk.f32.gmra.mxu2 %vm1248_vm5, %v1197_v43  ;;  %v1495_v43 = vld [vmem:[%s2523_s17 + $0x8] sm:$0xff] }
 0x288   : > { %v1141_v46 = vadd.f32 %v2283_v10, %v1140_v45  ;;  %v1224_v10 = vpop.f32.mrf.mxu3  ;;  %1515 = vmatpush.msra.mxu3 %v1495_v43 }
 0x28a   : > { %v1150_v47 = vmax.f32 %v1141_v46, -5.0 }
 0x28c   : > { %v1158_v48 = vmin.f32 %v1150_v47, 2.0  ;;  %v1417_v47 = vld [vmem:[%s2522_s16 + $0x10] sm:$0xff] }
 0x28d   : > { %1458 = vmatpush.msra.mxu1 %v1417_v47 }
 0x28e   : > { %v1166_v49 = vmul.f32 0.5, %v1158_v48  ;;  %v1494_v48 = vld [vmem:[%s2523_s17] sm:$0xff] }
 0x28f   : > { %1516 = vmatpush.msra.mxu3 %v1494_v48 }
 0x290   : > { %v1181_v50 = vmul.f32 1.442695, %v1166_v49  ;;  %v1227_v57 = vpop.f32.mrf.mxu3  ;;  %1751 = vmatmul.msk.f32.vlgmr.msra.gmra.mxu3 %vm620_vm1, %v2074_v4  ;;  %v1416_v4 = vld [vmem:[%s2522_s16 + $0x8] sm:$0xff] }
 0x291   : > { %1459 = vmatpush.msra.mxu1 %v1416_v4 }
 0x292   : > { %1841 = vpow2.f32 %v1181_v50 }
 0x298   : > { %v1842_v51 = vpop.eup %1841  ;;  %v1230_v62 = vpop.f32.mrf.mxu3  ;;  %1752 = vmatmul.msk.f32.gmra.mxu3 %vm620_vm1, %v2078_v5  ;;  %v1415_v5 = vld [vmem:[%s2522_s16] sm:$0xff] }
 0x299   : > { %v1190_v53 = vmul.f32 %v1842_v51, %v2111_v14  ;;  %1460 = vmatpush.msra.mxu1 %v1415_v5 }
 0x29b   : > { %v1198_v54 = vadd.f32 %v1190_v53, %v2364_v52 }
 0x29d   : > { %1733 = vmatmul.msk.f32.gmra.mxu2 %vm1248_vm5, %v1198_v54 }
 0x2a0   : > { %v1233_v9 = vpop.f32.mrf.mxu3  ;;  %1753 = vmatmul.msk.f32.gmra.mxu3 %vm620_vm1, %v2082_v6  ;;  %v1826_v6 = vld [vmem:[%s2521_s15] ss:$0 sm:$0xff] }
 0x2a8   : > { %v1236_v20 = vpop.f32.mrf.mxu3  ;;  %1754 = vmatmul.msk.f32.gmra.mxu3 %vm620_vm1, %v2086_v7 }
 0x2b0   : > { %v1239_v28 = vpop.f32.mrf.mxu3  ;;  %1755 = vmatmul.msk.f32.gmra.mxu3 %vm620_vm1, %v2099_v11 }
 0x2b8   : > { %v1242_v39 = vpop.f32.mrf.mxu3  ;;  %1756 = vmatmul.msk.f32.gmra.mxu3 %vm620_vm1, %v2103_v12 }
 0x2c0   : > { %v1245_v51 = vpop.f32.mrf.mxu3  ;;  %1757 = vmatmul.msk.f32.gmra.mxu3 %vm620_vm1, %v2107_v13 }
 0x2c8   : > { %1758 = vmatmul.msk.f32.gmra.mxu3 %vm620_vm1, %v2111_v14 }
 0x2da   : > { %v1290_v27 = vpop.f32.mrf.mxu2 }
 0x2db   : > { %v1291_v59 = vadd.f32 %v1290_v27, %v1224_v10 }
 0x2dd   : > { %v1318_v60 = vadd.f32 %v2375_v58, %v1291_v59 }
 0x2df   : > { %v1326_v61 = vmax.f32 %v1318_v60, 0.0 }
 0x2e1   : > { %1734 = vmatmul.msk.f32.vlgmr.msra.gmra.mxu0 %vm1028_vm4, %v1326_v61 }
 0x2e2   : > { %v1293_v63 = vpop.f32.mrf.mxu2 }
 0x2e3   : > { %v1294_v0 = vadd.f32 %v1293_v63, %v1227_v57 }
 0x2e5   : > { %v1319_v2 = vadd.f32 %v2375_v58, %v1294_v0 }
 0x2e7   : > { %v1327_v3 = vmax.f32 %v1319_v2, 0.0 }
 0x2e9   : > { %1735 = vmatmul.msk.f32.gmra.mxu0 %vm1028_vm4, %v1327_v3 }
 0x2ea   : > { %v1296_v8 = vpop.f32.mrf.mxu2 }
 0x2eb   : > { %v1297_v15 = vadd.f32 %v1296_v8, %v1230_v62 }
 0x2ed   : > { %v1320_v16 = vadd.f32 %v2375_v58, %v1297_v15 }
 0x2ef   : > { %v1328_v17 = vmax.f32 %v1320_v16, 0.0 }
 0x2f1   : > { %1736 = vmatmul.msk.f32.gmra.mxu0 %vm1028_vm4, %v1328_v17 }
 0x2f2   : > { %v1299_v18 = vpop.f32.mrf.mxu2 }
 0x2f3   : > { %v1300_v19 = vadd.f32 %v1299_v18, %v1233_v9 }
 0x2f5   : > { %v1321_v22 = vadd.f32 %v2375_v58, %v1300_v19 }
 0x2f7   : > { %v1329_v23 = vmax.f32 %v1321_v22, 0.0 }
 0x2f9   : > { %1737 = vmatmul.msk.f32.gmra.mxu0 %vm1028_vm4, %v1329_v23 }
 0x2fa   : > { %v1302_v24 = vpop.f32.mrf.mxu2 }
 0x2fb   : > { %v1303_v25 = vadd.f32 %v1302_v24, %v1236_v20 }
 0x2fd   : > { %v1322_v26 = vadd.f32 %v2375_v58, %v1303_v25 }
 0x2ff   : > { %v1330_v29 = vmax.f32 %v1322_v26, 0.0 }
 0x301   : > { %1738 = vmatmul.msk.f32.gmra.mxu0 %vm1028_vm4, %v1330_v29 }
 0x302   : > { %v1305_v30 = vpop.f32.mrf.mxu2 }
 0x303   : > { %v1306_v32 = vadd.f32 %v1305_v30, %v1239_v28 }
 0x305   : > { %v1323_v34 = vadd.f32 %v2375_v58, %v1306_v32 }
 0x307   : > { %v1331_v35 = vmax.f32 %v1323_v34, 0.0 }
 0x309   : > { %1739 = vmatmul.msk.f32.gmra.mxu0 %vm1028_vm4, %v1331_v35 }
 0x30a   : > { %v1308_v45 = vpop.f32.mrf.mxu2 }
 0x30b   : > { %v1309_v46 = vadd.f32 %v1308_v45, %v1242_v39 }
 0x30d   : > { %v1324_v49 = vadd.f32 %v2375_v58, %v1309_v46 }
 0x30f   : > { %v1332_v50 = vmax.f32 %v1324_v49, 0.0 }
 0x311   : > { %1740 = vmatmul.msk.f32.gmra.mxu0 %vm1028_vm4, %v1332_v50 }
 0x313   : > { %v1518_v22 = vpop.f32.mrf.mxu3 }
 0x31b   : > { %v1521_v23 = vpop.f32.mrf.mxu3 }
 0x320   : > { %v1311_v53 = vpop.f32.mrf.mxu2 }
 0x321   : > { %v1312_v54 = vadd.f32 %v1311_v53, %v1245_v51 }
 0x323   : > { %v1325_v56 = vadd.f32 %v2375_v58, %v1312_v54  ;;  %v1524_v29 = vpop.f32.mrf.mxu3 }
 0x325   : > { %v1333_v10 = vmax.f32 %v1325_v56, 0.0 }
 0x327   : > { %1741 = vmatmul.msk.f32.gmra.mxu0 %vm1028_vm4, %v1333_v10 }
 0x32b   : > { %v1527_v36 = vpop.f32.mrf.mxu3 }
 0x333   : > { %v1530_v40 = vpop.f32.mrf.mxu3 }
 0x33b   : > { %v1533_v45 = vpop.f32.mrf.mxu3 }
 0x35e   : > { %v1383_v7 = vpop.f32.mrf.mxu0 }
 0x35f   : > { %v1384_v11 = vadd.f32 %v1826_v6, %v1383_v7 }
 0x361   : > { %v1407_v12 = vmax.f32 %v1384_v11, 0.0 }
 0x363   : > { %1742 = vmatmul.msk.f32.vlgmr.msra.gmra.mxu1 %vm922_vm3, %v1407_v12 }
 0x366   : > { %v1386_v57 = vpop.f32.mrf.mxu0 }
 0x367   : > { %v1387_v13 = vadd.f32 %v1826_v6, %v1386_v57 }
 0x369   : > { %v1408_v58 = vmax.f32 %v1387_v13, 0.0 }
 0x36b   : > { %1743 = vmatmul.msk.f32.gmra.mxu1 %vm922_vm3, %v1408_v58 }
 0x36e   : > { %v1389_v27 = vpop.f32.mrf.mxu0 }
 0x36f   : > { %v1390_v59 = vadd.f32 %v1826_v6, %v1389_v27 }
 0x371   : > { %v1409_v60 = vmax.f32 %v1390_v59, 0.0 }
 0x373   : > { %1744 = vmatmul.msk.f32.gmra.mxu1 %vm922_vm3, %v1409_v60 }
 0x376   : > { %v1392_v14 = vpop.f32.mrf.mxu0 }
 0x377   : > { %v1393_v61 = vadd.f32 %v1826_v6, %v1392_v14 }
 0x379   : > { %v1410_v62 = vmax.f32 %v1393_v61, 0.0 }
 0x37b   : > { %1745 = vmatmul.msk.f32.gmra.mxu1 %vm922_vm3, %v1410_v62 }
 0x37e   : > { %v1395_v63 = vpop.f32.mrf.mxu0 }
 0x37f   : > { %v1396_v0 = vadd.f32 %v1826_v6, %v1395_v63 }
 0x381   : > { %v1411_v2 = vmax.f32 %v1396_v0, 0.0 }
 0x383   : > { %1746 = vmatmul.msk.f32.gmra.mxu1 %vm922_vm3, %v1411_v2 }
 0x386   : > { %v1398_v3 = vpop.f32.mrf.mxu0 }
 0x387   : > { %v1399_v8 = vadd.f32 %v1826_v6, %v1398_v3 }
 0x389   : > { %v1412_v9 = vmax.f32 %v1399_v8, 0.0 }
 0x38b   : > { %1747 = vmatmul.msk.f32.gmra.mxu1 %vm922_vm3, %v1412_v9 }
 0x38e   : > { %v1401_v15 = vpop.f32.mrf.mxu0 }
 0x38f   : > { %v1402_v16 = vadd.f32 %v1826_v6, %v1401_v15 }
 0x391   : > { %v1413_v17 = vmax.f32 %v1402_v16, 0.0 }
 0x393   : > { %1748 = vmatmul.msk.f32.gmra.mxu1 %vm922_vm3, %v1413_v17 }
 0x3a4   : > { %v1404_v18 = vpop.f32.mrf.mxu0 }
 0x3a5   : > { %v1405_v19 = vadd.f32 %v1826_v6, %v1404_v18 }
 0x3a7   : > { %v1414_v20 = vmax.f32 %v1405_v19, 0.0 }
 0x3a9   : > { %1749 = vmatmul.msk.f32.gmra.mxu1 %vm922_vm3, %v1414_v20 }
 0x3e0   : > { %v1462_v24 = vpop.f32.mrf.mxu1 }
 0x3e1   : > { %v1486_v25 = vadd.f32 %v1462_v24, %v2300_v33 }
 0x3e3   : > { %v1542_v26 = vadd.f32 %v1518_v22, %v1486_v25 }
 0x3e5   : > { %1550 = vst [vmem:[%s2455_s23] sm:$0xff] %v1542_v26 }
 0x3e8   : > { %v1465_v28 = vpop.f32.mrf.mxu1 }
 0x3e9   : > { %v1487_v30 = vadd.f32 %v1465_v28, %v2309_v44 }
 0x3eb   : > { %v1543_v32 = vadd.f32 %v1521_v23, %v1487_v30 }
 0x3ed   : > { %1551 = vst [vmem:[%s2455_s23 + $0x8] sm:$0xff] %v1543_v32 }
 0x3f0   : > { %v1468_v34 = vpop.f32.mrf.mxu1 }
 0x3f1   : > { %v1488_v35 = vadd.f32 %v1468_v34, %v2318_v55 }
 0x3f3   : > { %v1544_v33 = vadd.f32 %v1524_v29, %v1488_v35 }
 0x3f5   : > { %1552 = vst [vmem:[%s2455_s23 + $0x10] sm:$0xff] %v1544_v33 }
 0x3f8   : > { %v1471_v37 = vpop.f32.mrf.mxu1 }
 0x3f9   : > { %v1489_v38 = vadd.f32 %v1471_v37, %v2327_v1  ;;  %v1536_v1 = vpop.f32.mrf.mxu3 }
 0x3fb   : > { %v1545_v39 = vadd.f32 %v1527_v36, %v1489_v38 }
 0x3fd   : > { %1553 = vst [vmem:[%s2455_s23 + $0x18] sm:$0xff] %v1545_v39 }
 0x400   : > { %v1474_v42 = vpop.f32.mrf.mxu1 }
 0x401   : > { %v1490_v44 = vadd.f32 %v1474_v42, %v2336_v21 }
 0x403   : > { %v1546_v43 = vadd.f32 %v1530_v40, %v1490_v44 }
 0x405   : > { %1554 = vst [vmem:[%s2455_s23 + $0x20] sm:$0xff] %v1546_v43 }
 0x408   : > { %v1477_v55 = vpop.f32.mrf.mxu1 }
 0x409   : > { %v1491_v46 = vadd.f32 %v1477_v55, %v2342_v31  ;;  %v1539_v31 = vpop.f32.mrf.mxu3 }
 0x40b   : > { %v1547_v47 = vadd.f32 %v1533_v45, %v1491_v46 }
 0x40d   : > { %1555 = vst [vmem:[%s2455_s23 + $0x28] sm:$0xff] %v1547_v47 }
 0x410   : > { %v1480_v48 = vpop.f32.mrf.mxu1 }
 0x411   : > { %v1492_v49 = vadd.f32 %v1480_v48, %v2357_v41 }
 0x413   : > { %v1548_v50 = vadd.f32 %v1536_v1, %v1492_v49 }
 0x415   : > { %1556 = vst [vmem:[%s2455_s23 + $0x30] sm:$0xff] %v1548_v50 }
 0x426   : > { %v1483_v21 = vpop.f32.mrf.mxu1 }
 0x427   : > { %v1493_v51 = vadd.f32 %v1483_v21, %v2364_v52 }
 0x429   : > { %v1549_v53 = vadd.f32 %v1539_v31, %v1493_v51 }
 0x42b   : > { %1557 = vst [vmem:[%s2455_s23 + $0x38] sm:$0xff] %v1549_v53 }
 0x42c   : > { %1870 = shalt.err (!%p1867_p3)
}
 0x42d   : > { %s1907_s28 = smov 128   ;;  %s1908_s23 = smov 8  }
 0x42e   : > { %1779 = dma.vmem_to_hbm [thread:$0]  (%p2047_p5), %s1572_s0, 1024, %s1574_s29, %s1559_s27, %s1907_s28, %s1907_s28, %s1908_s23  }
 0x42f PF: > { %s2555_s5 = sld [smem:[#allocation5_spill]]  ;;  %p1785_p4 = scmp.ge.s32.totalorder %s1905_s21, 2 }
 0x431   : > { %p1782_p7 = pnand %p1785_p4, %p2051_p6 }
 0x433   : > { %p1783_p8 = pneg %p1782_p7 }
 0x435   : > { %s1588_s20 = sand.u32 1, %s2555_s5  }
 0x436   : > { %s1589_s4 = scalar_lea.sflag [#allocation3], %s1588_s20 }
 0x437   : > { %1888 = dma.done.wait (%p1783_p8), %s1589_s4, 1024  }
 0x438   : > { %1890 = vsyncadd (%p1783_p8), %s1589_s4, 4294966272  ;;  %s2557_s21 = sld [smem:[#allocation7_spill]]  ;;  %s2560_s0 = smov %s1897_s30 }
 0x439   : > { %s2558_s22 = sld [smem:[#allocation6_spill]] }
 0x43a   : > { %s2559_s20 = sld [smem:[#allocation8_spill]] }
 0x43e   : > { %p29_p9 = scmp.ge.s32.totalorder %s2557_s21, 4  }
 0x43f   : > { %s2561_s30 = smov %s2558_s22 }
 0x440   :  { %31 = sbr.rel (!%p29_p9) target bundleno = 11 (0xb), region = 131 }
 0x445   :  { %1595 = vsyncpa [#allocation3], 1 }
 0x446   :  { %1597 = vsyncpa [#allocation3 + $0x1], 1 }

</bundles_post_ra>
